<compile_context>
chip_gen: v7x
topology: tpu7x:2x2x1
jax: 0.10.0
libtpu: 0.0.40
codegen_flags: <defaults>
</compile_context>

<pallas_src>
import math

import jax
import jax.numpy as jnp
from jax import lax
from jax.experimental import pallas as pl
from jax.experimental.pallas import tpu as pltpu

# ---- small synthetic GPT config (GPTConfig analogue) ----
BLOCK_SIZE = 16     # config.block_size
VOCAB = 128         # config.vocab_size
N_LAYER = 2         # config.n_layer
N_HEAD = 4          # config.n_head
N_EMBD = 32         # config.n_embd
HEAD_DIM = N_EMBD // N_HEAD


# ---------------- in-kernel helpers (f32 math) ----------------
def _layernorm(x, w, b, eps=1e-5):
    # PyTorch nn.LayerNorm: biased variance, eps inside sqrt.
    mu = jnp.mean(x, axis=-1, keepdims=True)
    xc = x - mu
    var = jnp.mean(xc * xc, axis=-1, keepdims=True)
    return xc * lax.rsqrt(var + eps) * w + b


def _new_gelu(x):
    # NewGELU (OpenAI tanh approximation)
    c = math.sqrt(2.0 / math.pi)
    return 0.5 * x * (1.0 + jnp.tanh(c * (x + 0.044715 * x * x * x)))


# ---------------- fused GPT kernel (all layers + ln_f + last-token lm_head) ----------------
def _make_gpt_kernel(B, T):
    C, HD, NH, L = N_EMBD, HEAD_DIM, N_HEAD, N_LAYER
    bf16 = jnp.bfloat16

    def kernel(x_ref, wqkv_ref, bqkv_ref, wo_ref, wfc_ref, bfc_ref, wp_ref,
               vec_ref, lnf_ref, wte_t_ref, o_ref):
        x = x_ref[...]                                          # (B*T, C) f32 residual stream
        row = lax.broadcasted_iota(jnp.int32, (T, T), 0)
        col = lax.broadcasted_iota(jnp.int32, (T, T), 1)
        causal = (row >= col)[None]                             # (1, T, T) lower-triangular

        def to_heads(z, off):
            # (B*T, 3C) slab -> (NH*B, T, HD) head-batched view using lane slices +
            # leading-axis stack (no cross-sublane transposes).
            zh = jnp.stack([z[:, off + h * HD: off + (h + 1) * HD] for h in range(NH)],
                           axis=0)                              # (NH, B*T, HD)
            return zh.reshape(NH * B, T, HD)

        for l in range(L):                                      # static unroll over layers
            vec_l = vec_ref[l]                                  # (6, C) packed tiny vectors
            # --- causal self attention ---
            h1 = _layernorm(x, vec_l[0:1, :], vec_l[1:2, :])    # (B*T, C)
            qkv = jnp.dot(h1.astype(bf16), wqkv_ref[l],
                          preferred_element_type=jnp.float32) + bqkv_ref[l]   # (B*T, 3C)
            q = to_heads(qkv, 0).astype(bf16)                   # 1/sqrt(HD) pre-folded into q
            k = to_heads(qkv, C).astype(bf16)
            v = to_heads(qkv, 2 * C).astype(bf16)

            att = jnp.einsum('ntd,nsd->nts', q, k,
                             preferred_element_type=jnp.float32)  # (NH*B, T, T)
            att = jnp.where(causal, att, -1e30)                 # large finite negative
            m = jnp.max(att, axis=-1, keepdims=True)
            p = jnp.exp(att - m)
            p = p * pl.reciprocal(jnp.sum(p, axis=-1, keepdims=True), approx=True)

            y = jnp.einsum('nts,nsd->ntd', p.astype(bf16), v,
                           preferred_element_type=jnp.float32)  # (NH*B, T, HD)
            yh = y.reshape(NH, B * T, HD)
            y2d = jnp.concatenate([yh[h] for h in range(NH)], axis=-1)   # (B*T, C), lane concat
            proj = jnp.dot(y2d.astype(bf16), wo_ref[l],
                           preferred_element_type=jnp.float32) + vec_l[4:5, :]
            x = x + proj

            # --- MLP ---
            h2 = _layernorm(x, vec_l[2:3, :], vec_l[3:4, :])
            f = _new_gelu(jnp.dot(h2.astype(bf16), wfc_ref[l],
                                  preferred_element_type=jnp.float32) + bfc_ref[l])
            x = x + jnp.dot(f.astype(bf16), wp_ref[l],
                            preferred_element_type=jnp.float32) + vec_l[5:6, :]

        # --- final layernorm + tied lm_head on LAST token of each sequence only ---
        x_last = x.reshape(B, T, C)[:, T - 1, :]                # (B, C)
        hf = _layernorm(x_last, lnf_ref[0:1, :], lnf_ref[1:2, :])
        o_ref[...] = jnp.dot(hf.astype(bf16), wte_t_ref[...],
                             preferred_element_type=jnp.float32)   # (B, V), lane-dense

    return kernel


# ---------------- parameter init (mirrors GPT._init_weights shapes/stds) ----------------
def init_params(key):
    keys = iter(jax.random.split(key, 4 * N_LAYER + 2))
    std = 0.02
    std_res = 0.02 / math.sqrt(2 * N_LAYER)
    C = N_EMBD

    def nrm(shape, s):
        return s * jax.random.normal(next(keys), shape, dtype=jnp.float32)

    params = {
        'wte': nrm((VOCAB, C), std),            # shared with lm_head (weight tying)
        'wpe': nrm((BLOCK_SIZE, C), std),
        'lnf_w': jnp.ones((C,), jnp.float32),
        'lnf_b': jnp.zeros((C,), jnp.float32),
        'blocks': [],
    }
    for _ in range(N_LAYER):
        params['blocks'].append(dict(
            ln1_w=jnp.ones((C,), jnp.float32),   ln1_b=jnp.zeros((C,), jnp.float32),
            c_attn_w=nrm((3 * C, C), std),       c_attn_b=jnp.zeros((3 * C,), jnp.float32),
            attn_proj_w=nrm((C, C), std_res),    attn_proj_b=jnp.zeros((C,), jnp.float32),
            ln2_w=jnp.ones((C,), jnp.float32),   ln2_b=jnp.zeros((C,), jnp.float32),
            c_fc_w=nrm((4 * C, C), std),         c_fc_b=jnp.zeros((4 * C,), jnp.float32),
            mlp_proj_w=nrm((C, 4 * C), std_res), mlp_proj_b=jnp.zeros((C,), jnp.float32),
        ))
    return params


# ---------------- one-time host-side prep: stack / transpose / fuse / cast ----------------
def prepare_fused_params(params):
    C, HD = N_EMBD, HEAD_DIM
    scale = 1.0 / math.sqrt(HD)
    bf16 = jnp.bfloat16
    # fold 1/sqrt(head_dim) into the q block of the fused qkv weight & bias
    qscale = jnp.concatenate([jnp.full((C,), scale, jnp.float32),
                              jnp.ones((2 * C,), jnp.float32)])

    def per_layer(fn):
        return jnp.stack([fn(bp) for bp in params['blocks']], axis=0)

    return {
        'wte': params['wte'],
        'wpe': params['wpe'],
        'wte_t': params['wte'].T.astype(bf16),                                   # (C, V)
        'lnf': jnp.stack([params['lnf_w'], params['lnf_b']], axis=0),            # (2, C) f32
        # fused, lane-dense per-layer matmul weights (bf16 for the MXU)
        'w_qkv': per_layer(lambda bp: (bp['c_attn_w'].T * qscale[None, :]).astype(bf16)),  # (L,C,3C)
        'b_qkv': per_layer(lambda bp: (bp['c_attn_b'] * qscale).reshape(1, 3 * C)),        # (L,1,3C) f32
        'w_o':   per_layer(lambda bp: bp['attn_proj_w'].T.astype(bf16)),                   # (L,C,C)
        'w_fc':  per_layer(lambda bp: bp['c_fc_w'].T.astype(bf16)),                        # (L,C,4C)
        'b_fc':  per_layer(lambda bp: bp['c_fc_b'].reshape(1, 4 * C)),                     # (L,1,4C) f32
        'w_p':   per_layer(lambda bp: bp['mlp_proj_w'].T.astype(bf16)),                    # (L,4C,C)
        # all tiny per-layer vectors packed into ONE slab:
        #   rows = [ln1_w, ln1_b, ln2_w, ln2_b, attn_proj_b, mlp_proj_b]
        'vecs':  per_layer(lambda bp: jnp.stack(
            [bp['ln1_w'], bp['ln1_b'], bp['ln2_w'], bp['ln2_b'],
             bp['attn_proj_b'], bp['mlp_proj_b']], axis=0)),                               # (L,6,C) f32
    }


# ---------------- full GPT forward (targets=None path) ----------------
@jax.jit
def gpt_forward(idx, fp):
    B, T = idx.shape
    assert T <= BLOCK_SIZE
    C, V = N_EMBD, VOCAB

    # embedding gathers are glue (plain JAX)
    pos = jnp.arange(T)
    x = fp['wte'][idx] + fp['wpe'][pos][None, :, :]            # (B, T, C)
    x2d = x.reshape(B * T, C)                                  # single slab, no batch grid

    vmem = pl.BlockSpec(memory_space=pltpu.MemorySpace.VMEM)
    logits_last = pl.pallas_call(
        _make_gpt_kernel(B, T),
        out_shape=jax.ShapeDtypeStruct((B, V), jnp.float32),   # last-token logits only
        in_specs=[vmem] * 10,
        out_specs=vmem,
    )(x2d, fp['w_qkv'], fp['b_qkv'], fp['w_o'], fp['w_fc'], fp['b_fc'],
      fp['w_p'], fp['vecs'], fp['lnf'], fp['wte_t'])

    logits = logits_last.reshape(B, 1, V)                      # matches lm_head(x[:, [-1], :])
    return logits, None
    # TODO(synk): training path (targets / cross_entropy) and generate() sampling loop
    # are host-side loss / control flow, not kernel work — not implemented.


if __name__ == "__main__":
    key = jax.random.PRNGKey(0)
    pkey, ikey = jax.random.split(key)
    params = init_params(pkey)
    fused = prepare_fused_params(params)
    idx = jax.random.randint(ikey, (2, 8), 0, VOCAB, dtype=jnp.int32)   # batch=2, seq=8
    logits, loss = gpt_forward(idx, fused)
    jax.block_until_ready(logits)
    assert logits.shape == (2, 1, VOCAB) and loss is None
    assert bool(jnp.all(jnp.isfinite(logits)))
    print("KERNEL_OK")
</pallas_src>

<mosaic_0001>
module attributes {stable_mosaic.version = 11 : i64} {
  func.func @kernel(%arg0: memref<16x32xf32, #tpu.memory_space<vmem>>, %arg1: memref<2x32x96xbf16, #tpu.memory_space<vmem>>, %arg2: memref<2x1x96xf32, #tpu.memory_space<vmem>>, %arg3: memref<2x32x32xbf16, #tpu.memory_space<vmem>>, %arg4: memref<2x32x128xbf16, #tpu.memory_space<vmem>>, %arg5: memref<2x1x128xf32, #tpu.memory_space<vmem>>, %arg6: memref<2x128x32xbf16, #tpu.memory_space<vmem>>, %arg7: memref<2x6x32xf32, #tpu.memory_space<vmem>>, %arg8: memref<2x32xf32, #tpu.memory_space<vmem>>, %arg9: memref<32x128xbf16, #tpu.memory_space<vmem>>, %arg10: memref<2x128xf32, #tpu.memory_space<vmem>>) attributes {dimension_semantics = [], scalar_prefetch = 0 : i64, scratch_operands = 0 : i64, tpu.core_type = #tpu.core_type<tc>} {
    %c0 = arith.constant 0 : index
    %c0_0 = arith.constant 0 : index
    %0 = vector.load %arg0[%c0, %c0_0] : memref<16x32xf32, #tpu.memory_space<vmem>>, vector<16x32xf32>
    %1 = tpu.iota {dimensions = array<i32: 0>} : vector<8x8xi32>
    %2 = tpu.iota {dimensions = array<i32: 1>} : vector<8x8xi32>
    %3 = arith.cmpi sge, %1, %2 : vector<8x8xi32>
    %4 = vector.shape_cast %3 : vector<8x8xi1> to vector<1x8x8xi1>
    %c0_1 = arith.constant 0 : index
    %c0_2 = arith.constant 0 : index
    %c0_3 = arith.constant 0 : index
    %5 = vector.load %arg7[%c0_1, %c0_2, %c0_3] : memref<2x6x32xf32, #tpu.memory_space<vmem>>, vector<1x6x32xf32>
    %6 = vector.shape_cast %5 : vector<1x6x32xf32> to vector<6x32xf32>
    %7 = vector.extract_strided_slice %6 {offsets = [0, 0], sizes = [1, 32], strides = [1, 1]} : vector<6x32xf32> to vector<1x32xf32>
    %8 = vector.extract_strided_slice %6 {offsets = [1, 0], sizes = [1, 32], strides = [1, 1]} : vector<6x32xf32> to vector<1x32xf32>
    %cst = arith.constant dense<0.000000e+00> : vector<16xf32>
    %9 = vector.multi_reduction <add>, %0, %cst [1] : vector<16x32xf32> to vector<16xf32>
    %10 = vector.shape_cast %9 : vector<16xf32> to vector<16x1xf32>
    %cst_4 = arith.constant 3.200000e+01 : f32
    %11 = vector.broadcast %cst_4 : f32 to vector<16x1xf32>
    %12 = arith.divf %10, %11 : vector<16x1xf32>
    %13 = vector.broadcast %12 : vector<16x1xf32> to vector<16x32xf32>
    %14 = arith.subf %0, %13 : vector<16x32xf32>
    %15 = arith.mulf %14, %14 : vector<16x32xf32>
    %cst_5 = arith.constant dense<0.000000e+00> : vector<16xf32>
    %16 = vector.multi_reduction <add>, %15, %cst_5 [1] : vector<16x32xf32> to vector<16xf32>
    %17 = vector.shape_cast %16 : vector<16xf32> to vector<16x1xf32>
    %cst_6 = arith.constant 3.200000e+01 : f32
    %18 = vector.broadcast %cst_6 : f32 to vector<16x1xf32>
    %19 = arith.divf %17, %18 : vector<16x1xf32>
    %cst_7 = arith.constant 9.99999974E-6 : f32
    %20 = vector.broadcast %cst_7 : f32 to vector<16x1xf32>
    %21 = arith.addf %19, %20 : vector<16x1xf32>
    %22 = math.rsqrt %21 : vector<16x1xf32>
    %23 = vector.broadcast %22 : vector<16x1xf32> to vector<16x32xf32>
    %24 = arith.mulf %14, %23 : vector<16x32xf32>
    %25 = vector.broadcast %7 : vector<1x32xf32> to vector<16x32xf32>
    %26 = arith.mulf %24, %25 : vector<16x32xf32>
    %27 = vector.broadcast %8 : vector<1x32xf32> to vector<16x32xf32>
    %28 = arith.addf %26, %27 : vector<16x32xf32>
    %29 = arith.truncf %28 : vector<16x32xf32> to vector<16x32xbf16>
    %c0_8 = arith.constant 0 : index
    %c0_9 = arith.constant 0 : index
    %c0_10 = arith.constant 0 : index
    %30 = vector.load %arg1[%c0_8, %c0_9, %c0_10] : memref<2x32x96xbf16, #tpu.memory_space<vmem>>, vector<1x32x96xbf16>
    %31 = vector.shape_cast %30 : vector<1x32x96xbf16> to vector<32x96xbf16>
    %cst_11 = arith.constant dense<0.000000e+00> : vector<16x96xf32>
    %32 = tpu.matmul %29, %31, %cst_11 {dimension_numbers = #tpu.dot_dimension_numbers<[1], [0], [0], [1], [0, 0, 1, 1], [], []>} : vector<16x32xbf16>, vector<32x96xbf16>, vector<16x96xf32> -> vector<16x96xf32>
    %c0_12 = arith.constant 0 : index
    %c0_13 = arith.constant 0 : index
    %c0_14 = arith.constant 0 : index
    %33 = vector.load %arg2[%c0_12, %c0_13, %c0_14] : memref<2x1x96xf32, #tpu.memory_space<vmem>>, vector<1x1x96xf32>
    %34 = vector.shape_cast %33 : vector<1x1x96xf32> to vector<1x96xf32>
    %35 = vector.broadcast %34 : vector<1x96xf32> to vector<16x96xf32>
    %36 = arith.addf %32, %35 : vector<16x96xf32>
    %37 = vector.extract_strided_slice %36 {offsets = [0, 0], sizes = [16, 8], strides = [1, 1]} : vector<16x96xf32> to vector<16x8xf32>
    %38 = vector.extract_strided_slice %36 {offsets = [0, 8], sizes = [16, 8], strides = [1, 1]} : vector<16x96xf32> to vector<16x8xf32>
    %39 = vector.extract_strided_slice %36 {offsets = [0, 16], sizes = [16, 8], strides = [1, 1]} : vector<16x96xf32> to vector<16x8xf32>
    %40 = vector.extract_strided_slice %36 {offsets = [0, 24], sizes = [16, 8], strides = [1, 1]} : vector<16x96xf32> to vector<16x8xf32>
    %41 = vector.shape_cast %37 : vector<16x8xf32> to vector<1x16x8xf32>
    %42 = vector.shape_cast %38 : vector<16x8xf32> to vector<1x16x8xf32>
    %43 = vector.shape_cast %39 : vector<16x8xf32> to vector<1x16x8xf32>
    %44 = vector.shape_cast %40 : vector<16x8xf32> to vector<1x16x8xf32>
    %45 = tpu.concatenate %41, %42, %43, %44 in 0 : vector<1x16x8xf32>, vector<1x16x8xf32>, vector<1x16x8xf32>, vector<1x16x8xf32> -> vector<4x16x8xf32>
    %46 = vector.shape_cast %45 : vector<4x16x8xf32> to vector<8x8x8xf32>
    %47 = arith.truncf %46 : vector<8x8x8xf32> to vector<8x8x8xbf16>
    %48 = vector.extract_strided_slice %36 {offsets = [0, 32], sizes = [16, 8], strides = [1, 1]} : vector<16x96xf32> to vector<16x8xf32>
    %49 = vector.extract_strided_slice %36 {offsets = [0, 40], sizes = [16, 8], strides = [1, 1]} : vector<16x96xf32> to vector<16x8xf32>
    %50 = vector.extract_strided_slice %36 {offsets = [0, 48], sizes = [16, 8], strides = [1, 1]} : vector<16x96xf32> to vector<16x8xf32>
    %51 = vector.extract_strided_slice %36 {offsets = [0, 56], sizes = [16, 8], strides = [1, 1]} : vector<16x96xf32> to vector<16x8xf32>
    %52 = vector.shape_cast %48 : vector<16x8xf32> to vector<1x16x8xf32>
    %53 = vector.shape_cast %49 : vector<16x8xf32> to vector<1x16x8xf32>
    %54 = vector.shape_cast %50 : vector<16x8xf32> to vector<1x16x8xf32>
    %55 = vector.shape_cast %51 : vector<16x8xf32> to vector<1x16x8xf32>
    %56 = tpu.concatenate %52, %53, %54, %55 in 0 : vector<1x16x8xf32>, vector<1x16x8xf32>, vector<1x16x8xf32>, vector<1x16x8xf32> -> vector<4x16x8xf32>
    %57 = vector.shape_cast %56 : vector<4x16x8xf32> to vector<8x8x8xf32>
    %58 = arith.truncf %57 : vector<8x8x8xf32> to vector<8x8x8xbf16>
    %59 = vector.extract_strided_slice %36 {offsets = [0, 64], sizes = [16, 8], strides = [1, 1]} : vector<16x96xf32> to vector<16x8xf32>
    %60 = vector.extract_strided_slice %36 {offsets = [0, 72], sizes = [16, 8], strides = [1, 1]} : vector<16x96xf32> to vector<16x8xf32>
    %61 = vector.extract_strided_slice %36 {offsets = [0, 80], sizes = [16, 8], strides = [1, 1]} : vector<16x96xf32> to vector<16x8xf32>
    %62 = vector.extract_strided_slice %36 {offsets = [0, 88], sizes = [16, 8], strides = [1, 1]} : vector<16x96xf32> to vector<16x8xf32>
    %63 = vector.shape_cast %59 : vector<16x8xf32> to vector<1x16x8xf32>
    %64 = vector.shape_cast %60 : vector<16x8xf32> to vector<1x16x8xf32>
    %65 = vector.shape_cast %61 : vector<16x8xf32> to vector<1x16x8xf32>
    %66 = vector.shape_cast %62 : vector<16x8xf32> to vector<1x16x8xf32>
    %67 = tpu.concatenate %63, %64, %65, %66 in 0 : vector<1x16x8xf32>, vector<1x16x8xf32>, vector<1x16x8xf32>, vector<1x16x8xf32> -> vector<4x16x8xf32>
    %68 = vector.shape_cast %67 : vector<4x16x8xf32> to vector<8x8x8xf32>
    %69 = arith.truncf %68 : vector<8x8x8xf32> to vector<8x8x8xbf16>
    "tpu.trace_start"() <{level = 10 : i32, message = "ntd,nsd->nts"}> : () -> ()
    %cst_15 = arith.constant dense<0.000000e+00> : vector<8x8x8xf32>
    %70 = tpu.matmul %47, %58, %cst_15 {dimension_numbers = #tpu.dot_dimension_numbers<[2], [2], [1], [1], [0, 0, 0, 1, 1, 1], [0], [0]>} : vector<8x8x8xbf16>, vector<8x8x8xbf16>, vector<8x8x8xf32> -> vector<8x8x8xf32>
    %cst_16 = arith.constant -1.000000e+30 : f32
    "tpu.trace_stop"() : () -> ()
    %71 = vector.shape_cast %4 : vector<1x8x8xi1> to vector<1x8x8xi1>
    %72 = vector.broadcast %71 : vector<1x8x8xi1> to vector<8x8x8xi1>
    %73 = vector.broadcast %cst_16 : f32 to vector<8x8x8xf32>
    %74 = arith.select %72, %70, %73 : vector<8x8x8xi1>, vector<8x8x8xf32>
    %cst_17 = arith.constant dense<0xFF800000> : vector<8x8xf32>
    %75 = vector.multi_reduction <maximumf>, %74, %cst_17 [2] : vector<8x8x8xf32> to vector<8x8xf32>
    %76 = vector.shape_cast %75 : vector<8x8xf32> to vector<8x8x1xf32>
    %77 = vector.broadcast %76 : vector<8x8x1xf32> to vector<8x8x8xf32>
    %78 = arith.subf %74, %77 : vector<8x8x8xf32>
    %79 = math.exp %78 : vector<8x8x8xf32>
    %cst_18 = arith.constant dense<0.000000e+00> : vector<8x8xf32>
    %80 = vector.multi_reduction <add>, %79, %cst_18 [2] : vector<8x8x8xf32> to vector<8x8xf32>
    %81 = vector.shape_cast %80 : vector<8x8xf32> to vector<8x8x1xf32>
    %82 = tpu.reciprocal %81 {approx = true} : vector<8x8x1xf32> -> vector<8x8x1xf32>
    %83 = vector.broadcast %82 : vector<8x8x1xf32> to vector<8x8x8xf32>
    %84 = arith.mulf %79, %83 : vector<8x8x8xf32>
    %85 = arith.truncf %84 : vector<8x8x8xf32> to vector<8x8x8xbf16>
    "tpu.trace_start"() <{level = 10 : i32, message = "nts,nsd->ntd"}> : () -> ()
    %cst_19 = arith.constant dense<0.000000e+00> : vector<8x8x8xf32>
    %86 = tpu.matmul %85, %69, %cst_19 {dimension_numbers = #tpu.dot_dimension_numbers<[2], [1], [1], [2], [0, 0, 0, 1, 1, 2], [0], [0]>} : vector<8x8x8xbf16>, vector<8x8x8xbf16>, vector<8x8x8xf32> -> vector<8x8x8xf32>
    "tpu.trace_stop"() : () -> ()
    %87 = vector.shape_cast %86 : vector<8x8x8xf32> to vector<4x16x8xf32>
    %88 = vector.extract_strided_slice %87 {offsets = [0, 0, 0], sizes = [1, 16, 8], strides = [1, 1, 1]} : vector<4x16x8xf32> to vector<1x16x8xf32>
    %89 = vector.shape_cast %88 : vector<1x16x8xf32> to vector<16x8xf32>
    %90 = vector.extract_strided_slice %87 {offsets = [1, 0, 0], sizes = [1, 16, 8], strides = [1, 1, 1]} : vector<4x16x8xf32> to vector<1x16x8xf32>
    %91 = vector.shape_cast %90 : vector<1x16x8xf32> to vector<16x8xf32>
    %92 = vector.extract_strided_slice %87 {offsets = [2, 0, 0], sizes = [1, 16, 8], strides = [1, 1, 1]} : vector<4x16x8xf32> to vector<1x16x8xf32>
    %93 = vector.shape_cast %92 : vector<1x16x8xf32> to vector<16x8xf32>
    %94 = vector.extract_strided_slice %87 {offsets = [3, 0, 0], sizes = [1, 16, 8], strides = [1, 1, 1]} : vector<4x16x8xf32> to vector<1x16x8xf32>
    %95 = vector.shape_cast %94 : vector<1x16x8xf32> to vector<16x8xf32>
    %96 = tpu.concatenate %89, %91, %93, %95 in 1 : vector<16x8xf32>, vector<16x8xf32>, vector<16x8xf32>, vector<16x8xf32> -> vector<16x32xf32>
    %97 = arith.truncf %96 : vector<16x32xf32> to vector<16x32xbf16>
    %c0_20 = arith.constant 0 : index
    %c0_21 = arith.constant 0 : index
    %c0_22 = arith.constant 0 : index
    %98 = vector.load %arg3[%c0_20, %c0_21, %c0_22] : memref<2x32x32xbf16, #tpu.memory_space<vmem>>, vector<1x32x32xbf16>
    %99 = vector.shape_cast %98 : vector<1x32x32xbf16> to vector<32x32xbf16>
    %cst_23 = arith.constant dense<0.000000e+00> : vector<16x32xf32>
    %100 = tpu.matmul %97, %99, %cst_23 {dimension_numbers = #tpu.dot_dimension_numbers<[1], [0], [0], [1], [0, 0, 1, 1], [], []>} : vector<16x32xbf16>, vector<32x32xbf16>, vector<16x32xf32> -> vector<16x32xf32>
    %101 = vector.extract_strided_slice %6 {offsets = [4, 0], sizes = [1, 32], strides = [1, 1]} : vector<6x32xf32> to vector<1x32xf32>
    %102 = vector.broadcast %101 : vector<1x32xf32> to vector<16x32xf32>
    %103 = arith.addf %100, %102 : vector<16x32xf32>
    %104 = arith.addf %0, %103 : vector<16x32xf32>
    %105 = vector.extract_strided_slice %6 {offsets = [2, 0], sizes = [1, 32], strides = [1, 1]} : vector<6x32xf32> to vector<1x32xf32>
    %106 = vector.extract_strided_slice %6 {offsets = [3, 0], sizes = [1, 32], strides = [1, 1]} : vector<6x32xf32> to vector<1x32xf32>
    %cst_24 = arith.constant dense<0.000000e+00> : vector<16xf32>
    %107 = vector.multi_reduction <add>, %104, %cst_24 [1] : vector<16x32xf32> to vector<16xf32>
    %108 = vector.shape_cast %107 : vector<16xf32> to vector<16x1xf32>
    %cst_25 = arith.constant 3.200000e+01 : f32
    %109 = vector.broadcast %cst_25 : f32 to vector<16x1xf32>
    %110 = arith.divf %108, %109 : vector<16x1xf32>
    %111 = vector.broadcast %110 : vector<16x1xf32> to vector<16x32xf32>
    %112 = arith.subf %104, %111 : vector<16x32xf32>
    %113 = arith.mulf %112, %112 : vector<16x32xf32>
    %cst_26 = arith.constant dense<0.000000e+00> : vector<16xf32>
    %114 = vector.multi_reduction <add>, %113, %cst_26 [1] : vector<16x32xf32> to vector<16xf32>
    %115 = vector.shape_cast %114 : vector<16xf32> to vector<16x1xf32>
    %cst_27 = arith.constant 3.200000e+01 : f32
    %116 = vector.broadcast %cst_27 : f32 to vector<16x1xf32>
    %117 = arith.divf %115, %116 : vector<16x1xf32>
    %cst_28 = arith.constant 9.99999974E-6 : f32
    %118 = vector.broadcast %cst_28 : f32 to vector<16x1xf32>
    %119 = arith.addf %117, %118 : vector<16x1xf32>
    %120 = math.rsqrt %119 : vector<16x1xf32>
    %121 = vector.broadcast %120 : vector<16x1xf32> to vector<16x32xf32>
    %122 = arith.mulf %112, %121 : vector<16x32xf32>
    %123 = vector.broadcast %105 : vector<1x32xf32> to vector<16x32xf32>
    %124 = arith.mulf %122, %123 : vector<16x32xf32>
    %125 = vector.broadcast %106 : vector<1x32xf32> to vector<16x32xf32>
    %126 = arith.addf %124, %125 : vector<16x32xf32>
    %127 = arith.truncf %126 : vector<16x32xf32> to vector<16x32xbf16>
    %c0_29 = arith.constant 0 : index
    %c0_30 = arith.constant 0 : index
    %c0_31 = arith.constant 0 : index
    %128 = vector.load %arg4[%c0_29, %c0_30, %c0_31] : memref<2x32x128xbf16, #tpu.memory_space<vmem>>, vector<1x32x128xbf16>
    %129 = vector.shape_cast %128 : vector<1x32x128xbf16> to vector<32x128xbf16>
    %cst_32 = arith.constant dense<0.000000e+00> : vector<16x128xf32>
    %130 = tpu.matmul %127, %129, %cst_32 {dimension_numbers = #tpu.dot_dimension_numbers<[1], [0], [0], [1], [0, 0, 1, 1], [], []>} : vector<16x32xbf16>, vector<32x128xbf16>, vector<16x128xf32> -> vector<16x128xf32>
    %c0_33 = arith.constant 0 : index
    %c0_34 = arith.constant 0 : index
    %c0_35 = arith.constant 0 : index
    %131 = vector.load %arg5[%c0_33, %c0_34, %c0_35] : memref<2x1x128xf32, #tpu.memory_space<vmem>>, vector<1x1x128xf32>
    %132 = vector.shape_cast %131 : vector<1x1x128xf32> to vector<1x128xf32>
    %133 = vector.broadcast %132 : vector<1x128xf32> to vector<16x128xf32>
    %134 = arith.addf %130, %133 : vector<16x128xf32>
    %cst_36 = arith.constant 5.000000e-01 : f32
    %135 = vector.broadcast %cst_36 : f32 to vector<16x128xf32>
    %136 = arith.mulf %135, %134 : vector<16x128xf32>
    %cst_37 = arith.constant 4.471500e-02 : f32
    %137 = vector.broadcast %cst_37 : f32 to vector<16x128xf32>
    %138 = arith.mulf %137, %134 : vector<16x128xf32>
    %139 = arith.mulf %138, %134 : vector<16x128xf32>
    %140 = arith.mulf %139, %134 : vector<16x128xf32>
    %141 = arith.addf %134, %140 : vector<16x128xf32>
    %cst_38 = arith.constant 0.797884583 : f32
    %142 = vector.broadcast %cst_38 : f32 to vector<16x128xf32>
    %143 = arith.mulf %142, %141 : vector<16x128xf32>
    %144 = math.tanh %143 : vector<16x128xf32>
    %cst_39 = arith.constant 1.000000e+00 : f32
    %145 = vector.broadcast %cst_39 : f32 to vector<16x128xf32>
    %146 = arith.addf %145, %144 : vector<16x128xf32>
    %147 = arith.mulf %136, %146 : vector<16x128xf32>
    %148 = arith.truncf %147 : vector<16x128xf32> to vector<16x128xbf16>
    %c0_40 = arith.constant 0 : index
    %c0_41 = arith.constant 0 : index
    %c0_42 = arith.constant 0 : index
    %149 = vector.load %arg6[%c0_40, %c0_41, %c0_42] : memref<2x128x32xbf16, #tpu.memory_space<vmem>>, vector<1x128x32xbf16>
    %150 = vector.shape_cast %149 : vector<1x128x32xbf16> to vector<128x32xbf16>
    %cst_43 = arith.constant dense<0.000000e+00> : vector<16x32xf32>
    %151 = tpu.matmul %148, %150, %cst_43 {dimension_numbers = #tpu.dot_dimension_numbers<[1], [0], [0], [1], [0, 0, 1, 1], [], []>} : vector<16x128xbf16>, vector<128x32xbf16>, vector<16x32xf32> -> vector<16x32xf32>
    %152 = arith.addf %104, %151 : vector<16x32xf32>
    %153 = vector.extract_strided_slice %6 {offsets = [5, 0], sizes = [1, 32], strides = [1, 1]} : vector<6x32xf32> to vector<1x32xf32>
    %154 = vector.broadcast %153 : vector<1x32xf32> to vector<16x32xf32>
    %155 = arith.addf %152, %154 : vector<16x32xf32>
    %c1 = arith.constant 1 : index
    %c0_44 = arith.constant 0 : index
    %c0_45 = arith.constant 0 : index
    %156 = vector.load %arg7[%c1, %c0_44, %c0_45] : memref<2x6x32xf32, #tpu.memory_space<vmem>>, vector<1x6x32xf32>
    %157 = vector.shape_cast %156 : vector<1x6x32xf32> to vector<6x32xf32>
    %158 = vector.extract_strided_slice %157 {offsets = [0, 0], sizes = [1, 32], strides = [1, 1]} : vector<6x32xf32> to vector<1x32xf32>
    %159 = vector.extract_strided_slice %157 {offsets = [1, 0], sizes = [1, 32], strides = [1, 1]} : vector<6x32xf32> to vector<1x32xf32>
    %cst_46 = arith.constant dense<0.000000e+00> : vector<16xf32>
    %160 = vector.multi_reduction <add>, %155, %cst_46 [1] : vector<16x32xf32> to vector<16xf32>
    %161 = vector.shape_cast %160 : vector<16xf32> to vector<16x1xf32>
    %cst_47 = arith.constant 3.200000e+01 : f32
    %162 = vector.broadcast %cst_47 : f32 to vector<16x1xf32>
    %163 = arith.divf %161, %162 : vector<16x1xf32>
    %164 = vector.broadcast %163 : vector<16x1xf32> to vector<16x32xf32>
    %165 = arith.subf %155, %164 : vector<16x32xf32>
    %166 = arith.mulf %165, %165 : vector<16x32xf32>
    %cst_48 = arith.constant dense<0.000000e+00> : vector<16xf32>
    %167 = vector.multi_reduction <add>, %166, %cst_48 [1] : vector<16x32xf32> to vector<16xf32>
    %168 = vector.shape_cast %167 : vector<16xf32> to vector<16x1xf32>
    %cst_49 = arith.constant 3.200000e+01 : f32
    %169 = vector.broadcast %cst_49 : f32 to vector<16x1xf32>
    %170 = arith.divf %168, %169 : vector<16x1xf32>
    %cst_50 = arith.constant 9.99999974E-6 : f32
    %171 = vector.broadcast %cst_50 : f32 to vector<16x1xf32>
    %172 = arith.addf %170, %171 : vector<16x1xf32>
    %173 = math.rsqrt %172 : vector<16x1xf32>
    %174 = vector.broadcast %173 : vector<16x1xf32> to vector<16x32xf32>
    %175 = arith.mulf %165, %174 : vector<16x32xf32>
    %176 = vector.broadcast %158 : vector<1x32xf32> to vector<16x32xf32>
    %177 = arith.mulf %175, %176 : vector<16x32xf32>
    %178 = vector.broadcast %159 : vector<1x32xf32> to vector<16x32xf32>
    %179 = arith.addf %177, %178 : vector<16x32xf32>
    %180 = arith.truncf %179 : vector<16x32xf32> to vector<16x32xbf16>
    %c1_51 = arith.constant 1 : index
    %c0_52 = arith.constant 0 : index
    %c0_53 = arith.constant 0 : index
    %181 = vector.load %arg1[%c1_51, %c0_52, %c0_53] : memref<2x32x96xbf16, #tpu.memory_space<vmem>>, vector<1x32x96xbf16>
    %182 = vector.shape_cast %181 : vector<1x32x96xbf16> to vector<32x96xbf16>
    %cst_54 = arith.constant dense<0.000000e+00> : vector<16x96xf32>
    %183 = tpu.matmul %180, %182, %cst_54 {dimension_numbers = #tpu.dot_dimension_numbers<[1], [0], [0], [1], [0, 0, 1, 1], [], []>} : vector<16x32xbf16>, vector<32x96xbf16>, vector<16x96xf32> -> vector<16x96xf32>
    %c1_55 = arith.constant 1 : index
    %c0_56 = arith.constant 0 : index
    %c0_57 = arith.constant 0 : index
    %184 = vector.load %arg2[%c1_55, %c0_56, %c0_57] : memref<2x1x96xf32, #tpu.memory_space<vmem>>, vector<1x1x96xf32>
    %185 = vector.shape_cast %184 : vector<1x1x96xf32> to vector<1x96xf32>
    %186 = vector.broadcast %185 : vector<1x96xf32> to vector<16x96xf32>
    %187 = arith.addf %183, %186 : vector<16x96xf32>
    %188 = vector.extract_strided_slice %187 {offsets = [0, 0], sizes = [16, 8], strides = [1, 1]} : vector<16x96xf32> to vector<16x8xf32>
    %189 = vector.extract_strided_slice %187 {offsets = [0, 8], sizes = [16, 8], strides = [1, 1]} : vector<16x96xf32> to vector<16x8xf32>
    %190 = vector.extract_strided_slice %187 {offsets = [0, 16], sizes = [16, 8], strides = [1, 1]} : vector<16x96xf32> to vector<16x8xf32>
    %191 = vector.extract_strided_slice %187 {offsets = [0, 24], sizes = [16, 8], strides = [1, 1]} : vector<16x96xf32> to vector<16x8xf32>
    %192 = vector.shape_cast %188 : vector<16x8xf32> to vector<1x16x8xf32>
    %193 = vector.shape_cast %189 : vector<16x8xf32> to vector<1x16x8xf32>
    %194 = vector.shape_cast %190 : vector<16x8xf32> to vector<1x16x8xf32>
    %195 = vector.shape_cast %191 : vector<16x8xf32> to vector<1x16x8xf32>
    %196 = tpu.concatenate %192, %193, %194, %195 in 0 : vector<1x16x8xf32>, vector<1x16x8xf32>, vector<1x16x8xf32>, vector<1x16x8xf32> -> vector<4x16x8xf32>
    %197 = vector.shape_cast %196 : vector<4x16x8xf32> to vector<8x8x8xf32>
    %198 = arith.truncf %197 : vector<8x8x8xf32> to vector<8x8x8xbf16>
    %199 = vector.extract_strided_slice %187 {offsets = [0, 32], sizes = [16, 8], strides = [1, 1]} : vector<16x96xf32> to vector<16x8xf32>
    %200 = vector.extract_strided_slice %187 {offsets = [0, 40], sizes = [16, 8], strides = [1, 1]} : vector<16x96xf32> to vector<16x8xf32>
    %201 = vector.extract_strided_slice %187 {offsets = [0, 48], sizes = [16, 8], strides = [1, 1]} : vector<16x96xf32> to vector<16x8xf32>
    %202 = vector.extract_strided_slice %187 {offsets = [0, 56], sizes = [16, 8], strides = [1, 1]} : vector<16x96xf32> to vector<16x8xf32>
    %203 = vector.shape_cast %199 : vector<16x8xf32> to vector<1x16x8xf32>
    %204 = vector.shape_cast %200 : vector<16x8xf32> to vector<1x16x8xf32>
    %205 = vector.shape_cast %201 : vector<16x8xf32> to vector<1x16x8xf32>
    %206 = vector.shape_cast %202 : vector<16x8xf32> to vector<1x16x8xf32>
    %207 = tpu.concatenate %203, %204, %205, %206 in 0 : vector<1x16x8xf32>, vector<1x16x8xf32>, vector<1x16x8xf32>, vector<1x16x8xf32> -> vector<4x16x8xf32>
    %208 = vector.shape_cast %207 : vector<4x16x8xf32> to vector<8x8x8xf32>
    %209 = arith.truncf %208 : vector<8x8x8xf32> to vector<8x8x8xbf16>
    %210 = vector.extract_strided_slice %187 {offsets = [0, 64], sizes = [16, 8], strides = [1, 1]} : vector<16x96xf32> to vector<16x8xf32>
    %211 = vector.extract_strided_slice %187 {offsets = [0, 72], sizes = [16, 8], strides = [1, 1]} : vector<16x96xf32> to vector<16x8xf32>
    %212 = vector.extract_strided_slice %187 {offsets = [0, 80], sizes = [16, 8], strides = [1, 1]} : vector<16x96xf32> to vector<16x8xf32>
    %213 = vector.extract_strided_slice %187 {offsets = [0, 88], sizes = [16, 8], strides = [1, 1]} : vector<16x96xf32> to vector<16x8xf32>
    %214 = vector.shape_cast %210 : vector<16x8xf32> to vector<1x16x8xf32>
    %215 = vector.shape_cast %211 : vector<16x8xf32> to vector<1x16x8xf32>
    %216 = vector.shape_cast %212 : vector<16x8xf32> to vector<1x16x8xf32>
    %217 = vector.shape_cast %213 : vector<16x8xf32> to vector<1x16x8xf32>
    %218 = tpu.concatenate %214, %215, %216, %217 in 0 : vector<1x16x8xf32>, vector<1x16x8xf32>, vector<1x16x8xf32>, vector<1x16x8xf32> -> vector<4x16x8xf32>
    %219 = vector.shape_cast %218 : vector<4x16x8xf32> to vector<8x8x8xf32>
    %220 = arith.truncf %219 : vector<8x8x8xf32> to vector<8x8x8xbf16>
    "tpu.trace_start"() <{level = 10 : i32, message = "ntd,nsd->nts"}> : () -> ()
    %cst_58 = arith.constant dense<0.000000e+00> : vector<8x8x8xf32>
    %221 = tpu.matmul %198, %209, %cst_58 {dimension_numbers = #tpu.dot_dimension_numbers<[2], [2], [1], [1], [0, 0, 0, 1, 1, 1], [0], [0]>} : vector<8x8x8xbf16>, vector<8x8x8xbf16>, vector<8x8x8xf32> -> vector<8x8x8xf32>
    %cst_59 = arith.constant -1.000000e+30 : f32
    "tpu.trace_stop"() : () -> ()
    %222 = vector.shape_cast %4 : vector<1x8x8xi1> to vector<1x8x8xi1>
    %223 = vector.broadcast %222 : vector<1x8x8xi1> to vector<8x8x8xi1>
    %224 = vector.broadcast %cst_59 : f32 to vector<8x8x8xf32>
    %225 = arith.select %223, %221, %224 : vector<8x8x8xi1>, vector<8x8x8xf32>
    %cst_60 = arith.constant dense<0xFF800000> : vector<8x8xf32>
    %226 = vector.multi_reduction <maximumf>, %225, %cst_60 [2] : vector<8x8x8xf32> to vector<8x8xf32>
    %227 = vector.shape_cast %226 : vector<8x8xf32> to vector<8x8x1xf32>
    %228 = vector.broadcast %227 : vector<8x8x1xf32> to vector<8x8x8xf32>
    %229 = arith.subf %225, %228 : vector<8x8x8xf32>
    %230 = math.exp %229 : vector<8x8x8xf32>
    %cst_61 = arith.constant dense<0.000000e+00> : vector<8x8xf32>
    %231 = vector.multi_reduction <add>, %230, %cst_61 [2] : vector<8x8x8xf32> to vector<8x8xf32>
    %232 = vector.shape_cast %231 : vector<8x8xf32> to vector<8x8x1xf32>
    %233 = tpu.reciprocal %232 {approx = true} : vector<8x8x1xf32> -> vector<8x8x1xf32>
    %234 = vector.broadcast %233 : vector<8x8x1xf32> to vector<8x8x8xf32>
    %235 = arith.mulf %230, %234 : vector<8x8x8xf32>
    %236 = arith.truncf %235 : vector<8x8x8xf32> to vector<8x8x8xbf16>
    "tpu.trace_start"() <{level = 10 : i32, message = "nts,nsd->ntd"}> : () -> ()
    %cst_62 = arith.constant dense<0.000000e+00> : vector<8x8x8xf32>
    %237 = tpu.matmul %236, %220, %cst_62 {dimension_numbers = #tpu.dot_dimension_numbers<[2], [1], [1], [2], [0, 0, 0, 1, 1, 2], [0], [0]>} : vector<8x8x8xbf16>, vector<8x8x8xbf16>, vector<8x8x8xf32> -> vector<8x8x8xf32>
    "tpu.trace_stop"() : () -> ()
    %238 = vector.shape_cast %237 : vector<8x8x8xf32> to vector<4x16x8xf32>
    %239 = vector.extract_strided_slice %238 {offsets = [0, 0, 0], sizes = [1, 16, 8], strides = [1, 1, 1]} : vector<4x16x8xf32> to vector<1x16x8xf32>
    %240 = vector.shape_cast %239 : vector<1x16x8xf32> to vector<16x8xf32>
    %241 = vector.extract_strided_slice %238 {offsets = [1, 0, 0], sizes = [1, 16, 8], strides = [1, 1, 1]} : vector<4x16x8xf32> to vector<1x16x8xf32>
    %242 = vector.shape_cast %241 : vector<1x16x8xf32> to vector<16x8xf32>
    %243 = vector.extract_strided_slice %238 {offsets = [2, 0, 0], sizes = [1, 16, 8], strides = [1, 1, 1]} : vector<4x16x8xf32> to vector<1x16x8xf32>
    %244 = vector.shape_cast %243 : vector<1x16x8xf32> to vector<16x8xf32>
    %245 = vector.extract_strided_slice %238 {offsets = [3, 0, 0], sizes = [1, 16, 8], strides = [1, 1, 1]} : vector<4x16x8xf32> to vector<1x16x8xf32>
    %246 = vector.shape_cast %245 : vector<1x16x8xf32> to vector<16x8xf32>
    %247 = tpu.concatenate %240, %242, %244, %246 in 1 : vector<16x8xf32>, vector<16x8xf32>, vector<16x8xf32>, vector<16x8xf32> -> vector<16x32xf32>
    %248 = arith.truncf %247 : vector<16x32xf32> to vector<16x32xbf16>
    %c1_63 = arith.constant 1 : index
    %c0_64 = arith.constant 0 : index
    %c0_65 = arith.constant 0 : index
    %249 = vector.load %arg3[%c1_63, %c0_64, %c0_65] : memref<2x32x32xbf16, #tpu.memory_space<vmem>>, vector<1x32x32xbf16>
    %250 = vector.shape_cast %249 : vector<1x32x32xbf16> to vector<32x32xbf16>
    %cst_66 = arith.constant dense<0.000000e+00> : vector<16x32xf32>
    %251 = tpu.matmul %248, %250, %cst_66 {dimension_numbers = #tpu.dot_dimension_numbers<[1], [0], [0], [1], [0, 0, 1, 1], [], []>} : vector<16x32xbf16>, vector<32x32xbf16>, vector<16x32xf32> -> vector<16x32xf32>
    %252 = vector.extract_strided_slice %157 {offsets = [4, 0], sizes = [1, 32], strides = [1, 1]} : vector<6x32xf32> to vector<1x32xf32>
    %253 = vector.broadcast %252 : vector<1x32xf32> to vector<16x32xf32>
    %254 = arith.addf %251, %253 : vector<16x32xf32>
    %255 = arith.addf %155, %254 : vector<16x32xf32>
    %256 = vector.extract_strided_slice %157 {offsets = [2, 0], sizes = [1, 32], strides = [1, 1]} : vector<6x32xf32> to vector<1x32xf32>
    %257 = vector.extract_strided_slice %157 {offsets = [3, 0], sizes = [1, 32], strides = [1, 1]} : vector<6x32xf32> to vector<1x32xf32>
    %cst_67 = arith.constant dense<0.000000e+00> : vector<16xf32>
    %258 = vector.multi_reduction <add>, %255, %cst_67 [1] : vector<16x32xf32> to vector<16xf32>
    %259 = vector.shape_cast %258 : vector<16xf32> to vector<16x1xf32>
    %cst_68 = arith.constant 3.200000e+01 : f32
    %260 = vector.broadcast %cst_68 : f32 to vector<16x1xf32>
    %261 = arith.divf %259, %260 : vector<16x1xf32>
    %262 = vector.broadcast %261 : vector<16x1xf32> to vector<16x32xf32>
    %263 = arith.subf %255, %262 : vector<16x32xf32>
    %264 = arith.mulf %263, %263 : vector<16x32xf32>
    %cst_69 = arith.constant dense<0.000000e+00> : vector<16xf32>
    %265 = vector.multi_reduction <add>, %264, %cst_69 [1] : vector<16x32xf32> to vector<16xf32>
    %266 = vector.shape_cast %265 : vector<16xf32> to vector<16x1xf32>
    %cst_70 = arith.constant 3.200000e+01 : f32
    %267 = vector.broadcast %cst_70 : f32 to vector<16x1xf32>
    %268 = arith.divf %266, %267 : vector<16x1xf32>
    %cst_71 = arith.constant 9.99999974E-6 : f32
    %269 = vector.broadcast %cst_71 : f32 to vector<16x1xf32>
    %270 = arith.addf %268, %269 : vector<16x1xf32>
    %271 = math.rsqrt %270 : vector<16x1xf32>
    %272 = vector.broadcast %271 : vector<16x1xf32> to vector<16x32xf32>
    %273 = arith.mulf %263, %272 : vector<16x32xf32>
    %274 = vector.broadcast %256 : vector<1x32xf32> to vector<16x32xf32>
    %275 = arith.mulf %273, %274 : vector<16x32xf32>
    %276 = vector.broadcast %257 : vector<1x32xf32> to vector<16x32xf32>
    %277 = arith.addf %275, %276 : vector<16x32xf32>
    %278 = arith.truncf %277 : vector<16x32xf32> to vector<16x32xbf16>
    %c1_72 = arith.constant 1 : index
    %c0_73 = arith.constant 0 : index
    %c0_74 = arith.constant 0 : index
    %279 = vector.load %arg4[%c1_72, %c0_73, %c0_74] : memref<2x32x128xbf16, #tpu.memory_space<vmem>>, vector<1x32x128xbf16>
    %280 = vector.shape_cast %279 : vector<1x32x128xbf16> to vector<32x128xbf16>
    %cst_75 = arith.constant dense<0.000000e+00> : vector<16x128xf32>
    %281 = tpu.matmul %278, %280, %cst_75 {dimension_numbers = #tpu.dot_dimension_numbers<[1], [0], [0], [1], [0, 0, 1, 1], [], []>} : vector<16x32xbf16>, vector<32x128xbf16>, vector<16x128xf32> -> vector<16x128xf32>
    %c1_76 = arith.constant 1 : index
    %c0_77 = arith.constant 0 : index
    %c0_78 = arith.constant 0 : index
    %282 = vector.load %arg5[%c1_76, %c0_77, %c0_78] : memref<2x1x128xf32, #tpu.memory_space<vmem>>, vector<1x1x128xf32>
    %283 = vector.shape_cast %282 : vector<1x1x128xf32> to vector<1x128xf32>
    %284 = vector.broadcast %283 : vector<1x128xf32> to vector<16x128xf32>
    %285 = arith.addf %281, %284 : vector<16x128xf32>
    %cst_79 = arith.constant 5.000000e-01 : f32
    %286 = vector.broadcast %cst_79 : f32 to vector<16x128xf32>
    %287 = arith.mulf %286, %285 : vector<16x128xf32>
    %cst_80 = arith.constant 4.471500e-02 : f32
    %288 = vector.broadcast %cst_80 : f32 to vector<16x128xf32>
    %289 = arith.mulf %288, %285 : vector<16x128xf32>
    %290 = arith.mulf %289, %285 : vector<16x128xf32>
    %291 = arith.mulf %290, %285 : vector<16x128xf32>
    %292 = arith.addf %285, %291 : vector<16x128xf32>
    %cst_81 = arith.constant 0.797884583 : f32
    %293 = vector.broadcast %cst_81 : f32 to vector<16x128xf32>
    %294 = arith.mulf %293, %292 : vector<16x128xf32>
    %295 = math.tanh %294 : vector<16x128xf32>
    %cst_82 = arith.constant 1.000000e+00 : f32
    %296 = vector.broadcast %cst_82 : f32 to vector<16x128xf32>
    %297 = arith.addf %296, %295 : vector<16x128xf32>
    %298 = arith.mulf %287, %297 : vector<16x128xf32>
    %299 = arith.truncf %298 : vector<16x128xf32> to vector<16x128xbf16>
    %c1_83 = arith.constant 1 : index
    %c0_84 = arith.constant 0 : index
    %c0_85 = arith.constant 0 : index
    %300 = vector.load %arg6[%c1_83, %c0_84, %c0_85] : memref<2x128x32xbf16, #tpu.memory_space<vmem>>, vector<1x128x32xbf16>
    %301 = vector.shape_cast %300 : vector<1x128x32xbf16> to vector<128x32xbf16>
    %cst_86 = arith.constant dense<0.000000e+00> : vector<16x32xf32>
    %302 = tpu.matmul %299, %301, %cst_86 {dimension_numbers = #tpu.dot_dimension_numbers<[1], [0], [0], [1], [0, 0, 1, 1], [], []>} : vector<16x128xbf16>, vector<128x32xbf16>, vector<16x32xf32> -> vector<16x32xf32>
    %303 = arith.addf %255, %302 : vector<16x32xf32>
    %304 = vector.extract_strided_slice %157 {offsets = [5, 0], sizes = [1, 32], strides = [1, 1]} : vector<6x32xf32> to vector<1x32xf32>
    %305 = vector.broadcast %304 : vector<1x32xf32> to vector<16x32xf32>
    %306 = arith.addf %303, %305 : vector<16x32xf32>
    %307 = vector.shape_cast %306 : vector<16x32xf32> to vector<2x8x32xf32>
    %308 = vector.extract_strided_slice %307 {offsets = [0, 7, 0], sizes = [2, 1, 32], strides = [1, 1, 1]} : vector<2x8x32xf32> to vector<2x1x32xf32>
    %309 = vector.shape_cast %308 : vector<2x1x32xf32> to vector<2x32xf32>
    %c0_87 = arith.constant 0 : index
    %c0_88 = arith.constant 0 : index
    %310 = vector.load %arg8[%c0_87, %c0_88] : memref<2x32xf32, #tpu.memory_space<vmem>>, vector<1x32xf32>
    %c1_89 = arith.constant 1 : index
    %c0_90 = arith.constant 0 : index
    %311 = vector.load %arg8[%c1_89, %c0_90] : memref<2x32xf32, #tpu.memory_space<vmem>>, vector<1x32xf32>
    %cst_91 = arith.constant dense<0.000000e+00> : vector<2xf32>
    %312 = vector.multi_reduction <add>, %309, %cst_91 [1] : vector<2x32xf32> to vector<2xf32>
    %313 = vector.shape_cast %312 : vector<2xf32> to vector<2x1xf32>
    %cst_92 = arith.constant 3.200000e+01 : f32
    %314 = vector.broadcast %cst_92 : f32 to vector<2x1xf32>
    %315 = arith.divf %313, %314 : vector<2x1xf32>
    %316 = vector.broadcast %315 : vector<2x1xf32> to vector<2x32xf32>
    %317 = arith.subf %309, %316 : vector<2x32xf32>
    %318 = arith.mulf %317, %317 : vector<2x32xf32>
    %cst_93 = arith.constant dense<0.000000e+00> : vector<2xf32>
    %319 = vector.multi_reduction <add>, %318, %cst_93 [1] : vector<2x32xf32> to vector<2xf32>
    %320 = vector.shape_cast %319 : vector<2xf32> to vector<2x1xf32>
    %cst_94 = arith.constant 3.200000e+01 : f32
    %321 = vector.broadcast %cst_94 : f32 to vector<2x1xf32>
    %322 = arith.divf %320, %321 : vector<2x1xf32>
    %cst_95 = arith.constant 9.99999974E-6 : f32
    %323 = vector.broadcast %cst_95 : f32 to vector<2x1xf32>
    %324 = arith.addf %322, %323 : vector<2x1xf32>
    %325 = math.rsqrt %324 : vector<2x1xf32>
    %326 = vector.broadcast %325 : vector<2x1xf32> to vector<2x32xf32>
    %327 = arith.mulf %317, %326 : vector<2x32xf32>
    %328 = vector.broadcast %310 : vector<1x32xf32> to vector<2x32xf32>
    %329 = arith.mulf %327, %328 : vector<2x32xf32>
    %330 = vector.broadcast %311 : vector<1x32xf32> to vector<2x32xf32>
    %331 = arith.addf %329, %330 : vector<2x32xf32>
    %332 = arith.truncf %331 : vector<2x32xf32> to vector<2x32xbf16>
    %c0_96 = arith.constant 0 : index
    %c0_97 = arith.constant 0 : index
    %333 = vector.load %arg9[%c0_96, %c0_97] : memref<32x128xbf16, #tpu.memory_space<vmem>>, vector<32x128xbf16>
    %cst_98 = arith.constant dense<0.000000e+00> : vector<2x128xf32>
    %334 = tpu.matmul %332, %333, %cst_98 {dimension_numbers = #tpu.dot_dimension_numbers<[1], [0], [0], [1], [0, 0, 1, 1], [], []>} : vector<2x32xbf16>, vector<32x128xbf16>, vector<2x128xf32> -> vector<2x128xf32>
    %c0_99 = arith.constant 0 : index
    %c0_100 = arith.constant 0 : index
    %335 = vector.load %arg10[%c0_99, %c0_100] : memref<2x128xf32, #tpu.memory_space<vmem>>, vector<2x128xf32>
    tpu.vector_store %arg10[%c0_99, %c0_100], %334 {strides = array<i32>} : memref<2x128xf32, #tpu.memory_space<vmem>>, vector<2x128xf32>,
    return
  }
}

</mosaic_0001>

<bundles_post_ra>
// kernel: gpt_forward.1
= control target key start
LH: loop header
LB: loop body
LE: loop exit
PB: predicated region body
PF: predicated region fallthrough
CT: control target
= control target key end

     0   :  { %vm45_vm0 = vcmask 261120   ;;  %s4414_s0 = inlined_call_operand.vmem [shape: f32[16,32], index: 0, kind: input, shape index: {}]   ;;  %s4415_s1 = inlined_call_operand.vmem [shape: bf16[2,32,96], index: 1, kind: input, shape index: {}]   ;;  %s4416_s2 = inlined_call_operand.vmem [shape: f32[2,1,96], index: 2, kind: input, shape index: {}]   ;;  %s4417_s3 = inlined_call_operand.vmem [shape: bf16[2,32,32], index: 3, kind: input, shape index: {}]   ;;  %s4418_s4 = inlined_call_operand.vmem [shape: bf16[2,32,128], index: 4, kind: input, shape index: {}]   ;;  %s4419_s5 = inlined_call_operand.vmem [shape: f32[2,1,128], index: 5, kind: input, shape index: {}]   ;;  %s4420_s6 = inlined_call_operand.vmem [shape: bf16[2,128,32], index: 6, kind: input, shape index: {}]   ;;  %s4421_s7 = inlined_call_operand.vmem [shape: f32[2,6,32], index: 7, kind: input, shape index: {}]   ;;  %s4422_s8 = inlined_call_operand.vmem [shape: f32[2,32], index: 8, kind: input, shape index: {}]   ;;  %s4423_s9 = inlined_call_operand.vmem [shape: bf16[32,128], index: 9, kind: input, shape index: {}]   ;;  %s4424_s10 = inlined_call_operand.hbm [shape: f32[2,128], index: 10, kind: output, shape index: {}]  }
   0x1   :  { %v3689_v0 = vld [vmem:[%s4414_s0] sm:$0xff]  ;;  %v3694_v1 = vld [vmem:[%s4414_s0 + $0x8] sm:$0xff] }
   0x2   :  { %v46_v2 = vsel %vm45_vm0, %v3689_v0, 0.0  ;;  %v49_v3 = vsel %vm45_vm0, %v3694_v1, 0.0 }
   0x3   :  { %47 = vadd.xlane.f32.xlu0 %v46_v2 }
   0x7   :  { %50 = vadd.xlane.f32.xlu0 %v49_v3 }
   0x8   :  { %15 = vsyncpa [#allocation3], 0  ;;  %v3474_v14 = vld [vmem:[%s4415_s1] sm:$0xff]   ;;  %v3620_v15 = vmov 0.0   ;;  %v3475_v16 = vld [vmem:[%s4415_s1 + $0x8] sm:$0xff]   ;;  %vm3621_vm1 = vmmov 0   ;;  %v39_v21 = vlaneseq }
   0x9   :  { %3115 = vmatprep.subr.bf16.mxu1 %v3620_v15  ;;  %3129 = vmatprep.subr.bf16.mxu0 %v3620_v15  ;;  %v3725_v26 = vld [vmem:[%s4421_s7] sm:$0x3f]  ;;  %s3622_s24 = smov 112   ;;  %s3623_s25 = smov 120   ;;  %vm184_vm2 = vcmask 64512   ;;  %vm685_vm3 = vcmask 1043456  }
   0xa   :  { %3116 = vmatpush3.bf16.msra.mxu1 %v3474_v14  ;;  %3119 = vmatprep.mubr.msk.bf16.mxu1 %vm3621_vm1, %v3620_v15  ;;  %v3719_v24 = vshrl.u32 %v39_v21, 7  ;;  %v2906_v39 = vld [vmem:[%s4416_s2] ss:$0 sm:$0xff]  ;;  %s3624_s26 = smov 104   ;;  %s3625_s27 = smov 96   ;;  %vm1091_vm5 = vcmask 130048  }
   0xb   :  { %3117 = vmatprep.subr.bf16.mxu1 %v3620_v15  ;;  %3131 = vmatprep.mubr.msk.bf16.mxu0 %vm3621_vm1, %v3620_v15  ;;  %s3626_s28 = smov 64   ;;  %s3627_s29 = smov 8   ;;  %vm1094_vm6 = vcmask 195584   ;;  %vm2766_vm7 = vcmask 261127   ;;  %vm2770_vm8 = vcmask 253952   ;;  %vm2833_vm9 = vcmask 1041409  }
   0xc   :  { %v75_v25 = vsub.s32 0, %v3719_v24  ;;  %v81_v30 = vsub.s32 1, %v3719_v24  ;;  %s3628_s14 = smov 16   ;;  %s3629_s15 = smov 24  }
   0xe   :  { %3118 = vmatpush3.bf16.msra.mxu1 %v3475_v16  ;;  %v76_v29 = vrot.slane %v3725_v26, %v75_v25  ;;  %v82_v34 = vrot.slane %v3725_v26, %v81_v30 }
   0xf   :  { %3123 = vmatprep.subr.bf16.mxu1 %v3620_v15 }
  0x90   :  { %v48_v4 = vpop.xlane.xlu0 %47 }
  0x91   :  { %v53_v5 = vmul.f32 0.03125, %v48_v4 }
  0x93   :  { %v55_v6 = vsub.f32 %v3689_v0, %v53_v5 }
  0x94   :  { %v51_v7 = vpop.xlane.xlu0 %50 }
  0x95   :  { %v54_v8 = vmul.f32 0.03125, %v51_v7  ;;  %v57_v9 = vmul.f32 %v55_v6, %v55_v6 }
  0x97   :  { %v56_v10 = vsub.f32 %v3694_v1, %v54_v8  ;;  %v59_v11 = vsel %vm45_vm0, %v57_v9, 0.0 }
  0x98   :  { %60 = vadd.xlane.f32.xlu1 %v59_v11 }
  0x99   :  { %v58_v12 = vmul.f32 %v56_v10, %v56_v10 }
  0x9b   :  { %v62_v13 = vsel %vm45_vm0, %v58_v12, 0.0 }
  0x9c   :  { %63 = vadd.xlane.f32.xlu1 %v62_v13 }
 0x125   :  { %v61_v17 = vpop.xlane.xlu1 %60 }
 0x126   :  { %v65_v18 = vmul.f32 0.03125, %v61_v17 }
 0x128   :  { %v67_v19 = vadd.f32 1e-05, %v65_v18 }
 0x129   :  { %v64_v20 = vpop.xlane.xlu1 %63 }
 0x12a   :  { %3504 = vrsqrt.f32 %v67_v19  ;;  %v66_v22 = vmul.f32 0.03125, %v64_v20 }
 0x12c   :  { %v68_v23 = vadd.f32 1e-05, %v66_v22  ;;  %v42_v22 = vand.u32 127, %v39_v21 }
 0x12e   :  { %3506 = vrsqrt.f32 %v68_v23  ;;  %vm3824_vm4 = vcmp.ge.s32.totalorder %v3719_v24, %v42_v22 }
 0x134   :  { %v3505_v27 = vpop.eup %3504 }
 0x135   :  { %v71_v28 = vmul.f32 %v3505_v27, %v55_v6 }
 0x137   :  { %v77_v33 = vmul.f32 %v76_v29, %v71_v28 }
 0x138   :  { %v3507_v31 = vpop.eup %3506 }
 0x139   :  { %v72_v32 = vmul.f32 %v3507_v31, %v56_v10  ;;  %v83_v36 = vadd.f32 %v82_v34, %v77_v33 }
 0x13b   :  { %v78_v35 = vmul.f32 %v76_v29, %v72_v32 }
 0x13d   :  { %v84_v37 = vadd.f32 %v82_v34, %v78_v35 }
 0x13f   :  { %v85_v38 = vpack.c.bf16 %v84_v37, %v83_v36 }
 0x141   :  { %3120 = vmatmul.mubr.msk.bf16.vlgmr.msra.gmra.mrb[0].mxu1 %vm45_vm0, %v85_v38 }
 0x142   :  { %3125 = vmatprep.mubr.msk.bf16.mxu1 %vm3621_vm1, %v3620_v15 }
 0x214   :  { %v146_v40 = vpop.f32.mrb[0].mxu1 }
 0x215   :  { %v3121_v41 = vpop.f32.mrb[1].mxu1  ;;  %v147_v43 = vadd.f32 %v2906_v39, %v146_v40 }
 0x216   :  { %v149_v42 = vpop.f32.mrb[2].mxu1 }
 0x217   :  { %v150_v44 = vadd.f32 %v2906_v39, %v149_v42  ;;  %v3122_v45 = vpop.f32.mrb[3].mxu1  ;;  %v173_v48 = vpack.c.bf16 %v147_v43, %v147_v43 }
 0x219   :  { %v3419_v46 = vpack.i.bf16 %v150_v44, %v147_v43  ;;  %v3742_v47 = vpack.c.bf16 %v150_v44, %v150_v44 }
 0x21b   :  { %3420 = vrot.lane.b32.xlu1 %v3419_v46, %s3622_s24  ;;  %3415 = vrot.lane.b32.xlu0 %v3419_v46, %s3623_s25 }
 0x21f   :  { %3425 = vrot.lane.b32.xlu1 %v3419_v46, %s3624_s26  ;;  %232 = vrot.lane.b32.xlu0 %v3742_v47, %s3625_s27 }
 0x223   :  { %182 = vrot.lane.b32.xlu1 %v173_v48, %s3625_s27 }
 0x28d   :  { %v3421_v49 = vpop.permute.xlu1 %3420  ;;  %v3416_v50 = vpop.permute.xlu0 %3415 }
 0x28e   :  { %v3418_v51 = vunpack.i.h.bf16 %v3416_v50  ;;  %v3417_v52 = vunpack.i.l.bf16 %v3416_v50  ;;  %v3423_v53 = vunpack.i.h.bf16 %v3421_v49  ;;  %v3422_v54 = vunpack.i.l.bf16 %v3421_v49 }
 0x290   :  { %v3748_v55 = vpack.c.bf16 %v3418_v51, %v3418_v51  ;;  %v3750_v56 = vpack.c.bf16 %v3417_v52, %v3417_v52  ;;  %v3757_v60 = vpack.c.bf16 %v3423_v53, %v3423_v53  ;;  %v3759_v61 = vpack.c.bf16 %v3422_v54, %v3422_v54 }
 0x291   :  { %v3426_v57 = vpop.permute.xlu1 %3425  ;;  %v233_v58 = vpop.permute.xlu0 %232 }
 0x292   :  { %281 = vrot.lane.b32.xlu1 %v3750_v56, %s3625_s27  ;;  %330 = vrot.lane.b32.xlu0 %v3748_v55, %s3625_s27  ;;  %v238_v59 = vsel %vm184_vm2, %v233_v58, 0  ;;  %v3428_v62 = vunpack.i.h.bf16 %v3426_v57  ;;  %v3427_v63 = vunpack.i.l.bf16 %v3426_v57 }
 0x293   :  { %3130 = vmatpush3.bf16.xpose.msra.mxu0 %v238_v59 }
 0x294   :  { %3141 = vmatprep.subr.bf16.mxu0 %v3620_v15  ;;  %v3767_v4 = vpack.c.bf16 %v3428_v62, %v3428_v62  ;;  %v3769_v5 = vpack.c.bf16 %v3427_v63, %v3427_v63 }
 0x295   :  { %v183_v2 = vpop.permute.xlu1 %182 }
 0x296   :  { %v189_v3 = vsel %vm184_vm2, %v183_v2, 0  ;;  %379 = vrot.lane.b32.xlu1 %v3759_v61, %s3625_s27  ;;  %428 = vrot.lane.b32.xlu0 %v3757_v60, %s3625_s27 }
 0x297   :  { %3124 = vmatpush3.bf16.xpose.msra.mxu1 %v189_v3 }
 0x298   :  { %3135 = vmatprep.subr.bf16.mxu1 %v3620_v15 }
 0x29a   :  { %477 = vrot.lane.b32.xlu1 %v3769_v5, %s3625_s27  ;;  %526 = vrot.lane.b32.xlu0 %v3767_v4, %s3625_s27 }
 0x29b   :  { %3132 = vmatmul.mubr.msk.bf16.vlgmr.msra.gmra.mrb[0].mxu0 %vm184_vm2, %v3742_v47 }
 0x29c   :  { %3143 = vmatprep.mubr.msk.bf16.mxu0 %vm3621_vm1, %v3620_v15 }
 0x29e   :  { %3126 = vmatmul.mubr.msk.bf16.vlgmr.msra.gmra.mrb[4].mxu1 %vm184_vm2, %v173_v48  ;;  %680 = vrot.lane.b32.xlu1 %v173_v48, %s3626_s28 }
 0x29f   :  { %3137 = vmatprep.mubr.msk.bf16.mxu1 %vm3621_vm1, %v3620_v15 }
 0x304   :  { %v282_v6 = vpop.permute.xlu1 %281  ;;  %v331_v7 = vpop.permute.xlu0 %330 }
 0x305   :  { %v287_v8 = vsel %vm184_vm2, %v282_v6, 0  ;;  %v336_v9 = vsel %vm184_vm2, %v331_v7, 0 }
 0x306   :  { %3136 = vmatpush3.bf16.xpose.msra.mxu1 %v287_v8  ;;  %3142 = vmatpush3.bf16.xpose.msra.mxu0 %v336_v9 }
 0x307   :  { %3147 = vmatprep.subr.bf16.mxu1 %v3620_v15  ;;  %3153 = vmatprep.subr.bf16.mxu0 %v3620_v15 }
 0x308   :  { %v380_v10 = vpop.permute.xlu1 %379  ;;  %v429_v11 = vpop.permute.xlu0 %428 }
 0x309   :  { %v385_v12 = vsel %vm184_vm2, %v380_v10, 0  ;;  %v434_v13 = vsel %vm184_vm2, %v429_v11, 0 }
 0x30c   :  { %v478_v14 = vpop.permute.xlu1 %477  ;;  %v527_v16 = vpop.permute.xlu0 %526 }
 0x30d   :  { %3138 = vmatmul.mubr.msk.bf16.vlgmr.msra.gmra.mrb[8].mxu1 %vm184_vm2, %v3750_v56  ;;  %3144 = vmatmul.mubr.msk.bf16.vlgmr.msra.gmra.mrb[4].mxu0 %vm184_vm2, %v3748_v55  ;;  %v483_v17 = vsel %vm184_vm2, %v478_v14, 0  ;;  %v532_v18 = vsel %vm184_vm2, %v527_v16, 0 }
 0x30e   :  { %3148 = vmatpush3.bf16.xpose.msra.mxu1 %v385_v12  ;;  %3154 = vmatpush3.bf16.xpose.msra.mxu0 %v434_v13 }
 0x30f   :  { %3149 = vmatprep.mubr.msk.bf16.mxu1 %vm3621_vm1, %v3620_v15  ;;  %3155 = vmatprep.mubr.msk.bf16.mxu0 %vm3621_vm1, %v3620_v15 }
 0x310   :  { %3159 = vmatprep.subr.bf16.mxu1 %v3620_v15  ;;  %3165 = vmatprep.subr.bf16.mxu0 %v3620_v15  ;;  %v681_v19 = vpop.permute.xlu1 %680 }
 0x311   :  { %v687_v20 = vsel %vm685_vm3, %v681_v19, 0 }
 0x315   :  { %3150 = vmatmul.mubr.msk.bf16.vlgmr.msra.gmra.mrb[12].mxu1 %vm184_vm2, %v3759_v61  ;;  %3156 = vmatmul.mubr.msk.bf16.vlgmr.msra.gmra.mrb[8].mxu0 %vm184_vm2, %v3757_v60 }
 0x316   :  { %3160 = vmatpush3.bf16.xpose.msra.mxu1 %v483_v17  ;;  %3166 = vmatpush3.bf16.xpose.msra.mxu0 %v532_v18 }
 0x317   :  { %3161 = vmatprep.mubr.msk.bf16.mxu1 %vm3621_vm1, %v3620_v15  ;;  %3167 = vmatprep.mubr.msk.bf16.mxu0 %vm3621_vm1, %v3620_v15 }
 0x318   :  { %3171 = vmatprep.subr.bf16.mxu1 %v3620_v15  ;;  %3177 = vmatprep.subr.bf16.mxu0 %v3620_v15 }
 0x31d   :  { %3162 = vmatmul.mubr.msk.bf16.vlgmr.msra.gmra.mrb[16].mxu1 %vm184_vm2, %v3769_v5  ;;  %3168 = vmatmul.mubr.msk.bf16.vlgmr.msra.gmra.mrb[12].mxu0 %vm184_vm2, %v3767_v4 }
 0x31e   :  { %3172 = vmatpush3.bf16.msra.mxu1 %v687_v20  ;;  %3179 = vmatprep.mubr.msk.bf16.mxu0 %vm3621_vm1, %v3620_v15 }
 0x31f   :  { %3173 = vmatprep.mubr.msk.bf16.mxu1 %vm3621_vm1, %v3620_v15  ;;  %3183 = vmatprep.subr.bf16.mxu1 %v3620_v15 }
 0x36e   :  { %v274_v27 = vpop.f32.mrb[0].mxu0 }
 0x36f   :  { %v577_v28 = vsel %vm3824_vm4, %v274_v27, -1e+30  ;;  %v3133_v29 = vpop.f32.mrb[1].mxu0 }
 0x370   :  { %v277_v31 = vpop.f32.mrb[2].mxu0  ;;  %v587_v32 = vsel %vm184_vm2, %v577_v28, -inf }
 0x371   :  { %588 = vmax.xlane.f32.xlu0 %v587_v32  ;;  %v3134_v33 = vpop.f32.mrb[3].mxu0  ;;  %v225_v34 = vpop.f32.mrb[4].mxu1 }
 0x372   :  { %v576_v35 = vsel %vm3824_vm4, %v225_v34, -1e+30  ;;  %v3127_v21 = vpop.f32.mrb[5].mxu1 }
 0x373   :  { %v228_v36 = vpop.f32.mrb[6].mxu1  ;;  %v584_v37 = vsel %vm184_vm2, %v576_v35, -inf }
 0x374   :  { %585 = vmax.xlane.f32.xlu1 %v584_v37  ;;  %v3128_v38 = vpop.f32.mrb[7].mxu1 }
 0x3e0   :  { %v323_v39 = vpop.f32.mrb[8].mxu1  ;;  %v372_v40 = vpop.f32.mrb[4].mxu0 }
 0x3e1   :  { %v578_v41 = vsel %vm3824_vm4, %v323_v39, -1e+30  ;;  %v3139_v42 = vpop.f32.mrb[9].mxu1  ;;  %v3145_v43 = vpop.f32.mrb[5].mxu0  ;;  %v579_v48 = vsel %vm3824_vm4, %v372_v40, -1e+30 }
 0x3e2   :  { %v326_v44 = vpop.f32.mrb[10].mxu1  ;;  %v375_v45 = vpop.f32.mrb[6].mxu0  ;;  %v590_v46 = vsel %vm184_vm2, %v578_v41, -inf  ;;  %v593_v51 = vsel %vm184_vm2, %v579_v48, -inf }
 0x3e3   :  { %v3146_v49 = vpop.f32.mrb[7].mxu0  ;;  %591 = vmax.xlane.f32.xlu0 %v590_v46  ;;  %v3140_v50 = vpop.f32.mrb[11].mxu1 }
 0x3e7   :  { %594 = vmax.xlane.f32.xlu0 %v593_v51 }
 0x3e8   :  { %v421_v52 = vpop.f32.mrb[12].mxu1  ;;  %v470_v53 = vpop.f32.mrb[8].mxu0 }
 0x3e9   :  { %v580_v54 = vsel %vm3824_vm4, %v421_v52, -1e+30  ;;  %v3844_v57 = vsel %vm3824_vm4, %v470_v53, -1e+30  ;;  %v3151_v58 = vpop.f32.mrb[13].mxu1  ;;  %v3157_v59 = vpop.f32.mrb[9].mxu0 }
 0x3ea   :  { %v424_v62 = vpop.f32.mrb[14].mxu1  ;;  %v473_v63 = vpop.f32.mrb[10].mxu0  ;;  %v599_v2 = vsel %vm184_vm2, %v3844_v57, -inf  ;;  %v596_v3 = vsel %vm184_vm2, %v580_v54, -inf }
 0x3eb   :  { %v3158_v6 = vpop.f32.mrb[11].mxu0  ;;  %600 = vmax.xlane.f32.xlu0 %v599_v2  ;;  %597 = vmax.xlane.f32.xlu1 %v596_v3  ;;  %v3152_v7 = vpop.f32.mrb[15].mxu1 }
 0x3f0   :  { %v519_v8 = vpop.f32.mrb[16].mxu1  ;;  %v568_v9 = vpop.f32.mrb[12].mxu0 }
 0x3f1   :  { %v582_v10 = vsel %vm3824_vm4, %v519_v8, -1e+30  ;;  %v3853_v11 = vsel %vm3824_vm4, %v568_v9, -1e+30  ;;  %v3163_v12 = vpop.f32.mrb[17].mxu1  ;;  %v3169_v13 = vpop.f32.mrb[13].mxu0 }
 0x3f2   :  { %v522_v14 = vpop.f32.mrb[18].mxu1  ;;  %v571_v16 = vpop.f32.mrb[14].mxu0  ;;  %v605_v17 = vsel %vm184_vm2, %v3853_v11, -inf  ;;  %v602_v18 = vsel %vm184_vm2, %v582_v10, -inf }
 0x3f3   :  { %v3170_v19 = vpop.f32.mrb[15].mxu0  ;;  %606 = vmax.xlane.f32.xlu0 %v605_v17  ;;  %603 = vmax.xlane.f32.xlu1 %v602_v18  ;;  %v3164_v20 = vpop.f32.mrb[19].mxu1 }
 0x3fe   :  { %v589_v22 = vpop.xlane.xlu0 %588 }
 0x3ff   :  { %v609_v27 = vsub.f32 %v577_v28, %v589_v22 }
 0x401   :  { %v586_v29 = vpop.xlane.xlu1 %585  ;;  %v618_v31 = vmul.f32 1.442695, %v609_v27 }
 0x402   :  { %v608_v32 = vsub.f32 %v576_v35, %v586_v29 }
 0x403   :  { %3508 = vpow2.f32 %v618_v31 }
 0x404   :  { %777 = vrot.lane.b32.xlu1 %v3750_v56, %s3626_s28  ;;  %v616_v33 = vmul.f32 1.442695, %v608_v32 }
 0x406   :  { %3510 = vpow2.f32 %v616_v33 }
 0x408   :  { %825 = vrot.lane.b32.xlu1 %v3748_v55, %s3626_s28 }
 0x409   :  { %729 = vrot.lane.b32.xlu0 %v3742_v47, %s3626_s28 }
 0x40d   :  { %v3509_v34 = vpop.eup %3508 }
 0x40e   :  { %v635_v21 = vsel %vm184_vm2, %v3509_v34, 0.0 }
 0x410   :  { %v3865_v36 = vpop.eup %3510 }
 0x411   :  { %v632_v55 = vsel %vm184_vm2, %v3865_v36, 0.0 }
 0x428   :  { %636 = vadd.xlane.f32.xlu0 %v635_v21 }
 0x42c   :  { %633 = vadd.xlane.f32.xlu1 %v632_v55 }
 0x43d   :  { %873 = vrot.lane.b32.xlu1 %v3759_v61, %s3626_s28 }
 0x470   :  { %v592_v47 = vpop.xlane.xlu0 %591 }
 0x471   :  { %v610_v56 = vsub.f32 %v578_v41, %v592_v47 }
 0x473   :  { %v620_v28 = vmul.f32 1.442695, %v610_v56 }
 0x474   :  { %v595_v35 = vpop.xlane.xlu0 %594 }
 0x475   :  { %3512 = vpow2.f32 %v620_v28  ;;  %v611_v37 = vsub.f32 %v579_v48, %v595_v35 }
 0x477   :  { %v622_v38 = vmul.f32 1.442695, %v611_v37 }
 0x478   :  { %v598_v39 = vpop.xlane.xlu1 %597  ;;  %v601_v43 = vpop.xlane.xlu0 %600 }
 0x479   :  { %3514 = vpow2.f32 %v622_v38  ;;  %v612_v40 = vsub.f32 %v580_v54, %v598_v39  ;;  %v613_v62 = vsub.f32 %v3844_v57, %v601_v43 }
 0x47b   :  { %v624_v42 = vmul.f32 1.442695, %v612_v40  ;;  %v626_v63 = vmul.f32 1.442695, %v613_v62 }
 0x47d   :  { %3516 = vpow2.f32 %v624_v42 }
 0x47f   :  { %v3871_v44 = vpop.eup %3512 }
 0x480   :  { %v607_v45 = vpop.xlane.xlu0 %606  ;;  %v604_v46 = vpop.xlane.xlu1 %603  ;;  %v638_v61 = vsel %vm184_vm2, %v3871_v44, 0.0 }
 0x481   :  { %v614_v49 = vsub.f32 %v582_v10, %v604_v46  ;;  %639 = vadd.xlane.f32.xlu1 %v638_v61  ;;  %v615_v2 = vsub.f32 %v3853_v11, %v607_v45 }
 0x483   :  { %v3875_v41 = vpop.eup %3514  ;;  %v628_v50 = vmul.f32 1.442695, %v614_v49  ;;  %v630_v3 = vmul.f32 1.442695, %v615_v2 }
 0x484   :  { %v730_v48 = vpop.permute.xlu0 %729  ;;  %v641_v51 = vsel %vm184_vm2, %v3875_v41, 0.0  ;;  %v778_v6 = vpop.permute.xlu1 %777 }
 0x485   :  { %v735_v52 = vsel %vm685_vm3, %v730_v48, 0  ;;  %642 = vadd.xlane.f32.xlu0 %v641_v51  ;;  %3518 = vpow2.f32 %v628_v50  ;;  %v783_v19 = vsel %vm685_vm3, %v778_v6, 0 }
 0x486   :  { %3178 = vmatpush3.bf16.msra.mxu0 %v735_v52  ;;  %3520 = vpow2.f32 %v626_v63 }
 0x487   :  { %3189 = vmatprep.subr.bf16.mxu0 %v3620_v15  ;;  %v3881_v53 = vpop.eup %3516  ;;  %3522 = vpow2.f32 %v630_v3 }
 0x488   :  { %v644_v54 = vsel %vm184_vm2, %v3881_v53, 0.0  ;;  %v826_v7 = vpop.permute.xlu1 %825 }
 0x489   :  { %645 = vadd.xlane.f32.xlu1 %v644_v54  ;;  %v831_v16 = vsel %vm685_vm3, %v826_v7, 0 }
 0x48f   :  { %v3885_v58 = vpop.eup %3518 }
 0x490   :  { %v650_v59 = vsel %vm184_vm2, %v3885_v58, 0.0  ;;  %v3895_v9 = vpop.eup %3520 }
 0x491   :  { %651 = vadd.xlane.f32.xlu1 %v650_v59  ;;  %v3899_v12 = vpop.eup %3522 }
 0x49b   :  { %921 = vrot.lane.b32.xlu0 %v3757_v60, %s3626_s28  ;;  %v647_v60 = vsel %vm184_vm2, %v3895_v9, 0.0 }
 0x4a2   :  { %969 = vrot.lane.b32.xlu1 %v3769_v5, %s3626_s28  ;;  %v653_v5 = vsel %vm184_vm2, %v3899_v12, 0.0 }
 0x4b5   :  { %v637_v8 = vpop.xlane.xlu0 %636 }
 0x4b6   :  { %3524 = vrcp.f32 %v637_v8 }
 0x4b9   :  { %v634_v10 = vpop.xlane.xlu1 %633 }
 0x4ba   :  { %3526 = vrcp.f32 %v634_v10  ;;  %648 = vadd.xlane.f32.xlu0 %v647_v60 }
 0x4bd   :  { %v874_v20 = vpop.permute.xlu1 %873 }
 0x4be   :  { %654 = vadd.xlane.f32.xlu0 %v653_v5  ;;  %v879_v21 = vsel %vm685_vm3, %v874_v20, 0 }
 0x4c0   :  { %v3525_v57 = vpop.eup %3524 }
 0x4c1   :  { %v665_v11 = vmul.f32 %v3525_v57, %v3509_v34 }
 0x4c3   :  { %v673_v13 = vpack.c.bf16 %v665_v11, %v665_v11 }
 0x4c4   :  { %v3527_v14 = vpop.eup %3526 }
 0x4c5   :  { %v664_v17 = vmul.f32 %v3527_v14, %v3865_v36  ;;  %3180 = vmatmul.mubr.msk.bf16.vlgmr.msra.gmra.mrb[16].mxu0 %vm184_vm2, %v673_v13 }
 0x4c6   :  { %3190 = vmatpush3.bf16.msra.mxu0 %v831_v16  ;;  %3191 = vmatprep.mubr.msk.bf16.mxu0 %vm3621_vm1, %v3620_v15 }
 0x4c7   :  { %v672_v18 = vpack.c.bf16 %v664_v17, %v664_v17  ;;  %3201 = vmatprep.subr.bf16.mxu0 %v3620_v15 }
 0x4c9   :  { %3174 = vmatmul.mubr.msk.bf16.vlgmr.msra.gmra.mrb[20].mxu1 %vm184_vm2, %v672_v18 }
 0x4ca   :  { %3184 = vmatpush3.bf16.msra.mxu1 %v783_v19  ;;  %3185 = vmatprep.mubr.msk.bf16.mxu1 %vm3621_vm1, %v3620_v15 }
 0x4cb   :  { %3195 = vmatprep.subr.bf16.mxu1 %v3620_v15 }
 0x4d4   :  { %1017 = vrot.lane.b32.xlu0 %v3767_v4, %s3626_s28 }
 0x50e   :  { %v640_v22 = vpop.xlane.xlu1 %639 }
 0x50f   :  { %3528 = vrcp.f32 %v640_v22  ;;  %v3476_v22 = vld [vmem:[%s4417_s3] sm:$0xff]  }
 0x512   :  { %v643_v27 = vpop.xlane.xlu0 %642 }
 0x513   :  { %3530 = vrcp.f32 %v643_v27 }
 0x516   :  { %v646_v29 = vpop.xlane.xlu1 %645  ;;  %v922_v55 = vpop.permute.xlu0 %921 }
 0x517   :  { %3532 = vrcp.f32 %v646_v29  ;;  %v927_v28 = vsel %vm685_vm3, %v922_v55, 0  ;;  %v3477_v29 = vld [vmem:[%s4417_s3 + $0x8] sm:$0xff]  }
 0x519   :  { %v3529_v31 = vpop.eup %3528 }
 0x51a   :  { %v666_v32 = vmul.f32 %v3529_v31, %v3871_v44 }
 0x51c   :  { %v674_v33 = vpack.c.bf16 %v666_v32, %v666_v32 }
 0x51d   :  { %v3531_v34 = vpop.eup %3530 }
 0x51e   :  { %v667_v36 = vmul.f32 %v3531_v34, %v3875_v41  ;;  %3186 = vmatmul.mubr.msk.bf16.vlgmr.msra.gmra.mrb[24].mxu1 %vm184_vm2, %v674_v33  ;;  %v652_v4 = vpop.xlane.xlu1 %651 }
 0x51f   :  { %3196 = vmatpush3.bf16.msra.mxu1 %v879_v21  ;;  %3197 = vmatprep.mubr.msk.bf16.mxu1 %vm3621_vm1, %v3620_v15  ;;  %3534 = vrcp.f32 %v652_v4 }
 0x520   :  { %v675_v47 = vpack.c.bf16 %v667_v36, %v667_v36  ;;  %3207 = vmatprep.subr.bf16.mxu1 %v3620_v15 }
 0x521   :  { %v3533_v56 = vpop.eup %3532 }
 0x522   :  { %3192 = vmatmul.mubr.msk.bf16.vlgmr.msra.gmra.mrb[20].mxu0 %vm184_vm2, %v675_v47  ;;  %v668_v35 = vmul.f32 %v3533_v56, %v3881_v53  ;;  %v970_v37 = vpop.permute.xlu1 %969 }
 0x523   :  { %3202 = vmatpush3.bf16.msra.mxu0 %v927_v28  ;;  %3203 = vmatprep.mubr.msk.bf16.mxu0 %vm3621_vm1, %v3620_v15  ;;  %v975_v39 = vsel %vm685_vm3, %v970_v37, 0 }
 0x524   :  { %3213 = vmatprep.subr.bf16.mxu0 %v3620_v15  ;;  %v676_v38 = vpack.c.bf16 %v668_v35, %v668_v35 }
 0x526   :  { %3198 = vmatmul.mubr.msk.bf16.vlgmr.msra.gmra.mrb[28].mxu1 %vm184_vm2, %v676_v38 }
 0x527   :  { %3208 = vmatpush3.bf16.msra.mxu1 %v975_v39  ;;  %3209 = vmatprep.mubr.msk.bf16.mxu1 %vm3621_vm1, %v3620_v15 }
 0x528   :  { %3219 = vmatprep.subr.bf16.mxu1 %v3620_v15 }
 0x529   :  { %v3535_v40 = vpop.eup %3534 }
 0x52a   :  { %v670_v42 = vmul.f32 %v3535_v40, %v3885_v58 }
 0x52c   :  { %v678_v43 = vpack.c.bf16 %v670_v42, %v670_v42 }
 0x52e   :  { %3210 = vmatmul.mubr.msk.bf16.vlgmr.msra.gmra.mrb[32].mxu1 %vm184_vm2, %v678_v43 }
 0x52f   :  { %3223 = vmatprep.mubr.msk.bf16.mxu1 %vm3621_vm1, %v3620_v15  ;;  %3220 = vmatpush3.bf16.msra.mxu1 %v3476_v22  ;;  %v1192_v22 = vsub.s32 2, %v3719_v24 }
 0x530   :  { %3221 = vmatprep.subr.bf16.mxu1 %v3620_v15 }
 0x533   :  { %3222 = vmatpush3.bf16.msra.mxu1 %v3477_v29  ;;  %v1193_v29 = vrot.slane %v3725_v26, %v1192_v22 }
 0x534   :  { %3235 = vmatprep.subr.bf16.mxu1 %v3620_v15 }
 0x547   :  { %v649_v44 = vpop.xlane.xlu0 %648 }
 0x548   :  { %3536 = vrcp.f32 %v649_v44 }
 0x54b   :  { %v655_v45 = vpop.xlane.xlu0 %654 }
 0x54c   :  { %3538 = vrcp.f32 %v655_v45 }
 0x54f   :  { %v1018_v49 = vpop.permute.xlu0 %1017 }
 0x550   :  { %v1023_v48 = vsel %vm685_vm3, %v1018_v49, 0 }
 0x552   :  { %v3537_v46 = vpop.eup %3536 }
 0x553   :  { %v669_v61 = vmul.f32 %v3537_v46, %v3895_v9 }
 0x555   :  { %v677_v41 = vpack.c.bf16 %v669_v61, %v669_v61 }
 0x556   :  { %v3539_v50 = vpop.eup %3538 }
 0x557   :  { %3204 = vmatmul.mubr.msk.bf16.vlgmr.msra.gmra.mrb[24].mxu0 %vm184_vm2, %v677_v41  ;;  %v671_v51 = vmul.f32 %v3539_v50, %v3899_v12 }
 0x558   :  { %3214 = vmatpush3.bf16.msra.mxu0 %v1023_v48  ;;  %3215 = vmatprep.mubr.msk.bf16.mxu0 %vm3621_vm1, %v3620_v15  ;;  %v1104_v48 = vsub.s32 4, %v3719_v24 }
 0x559   :  { %3227 = vmatprep.subr.bf16.mxu0 %v3620_v15  ;;  %v679_v52 = vpack.c.bf16 %v671_v51, %v671_v51 }
 0x55a   :  { %v1105_v51 = vrot.slane %v3725_v26, %v1104_v48 }
 0x55f   :  { %3216 = vmatmul.mubr.msk.bf16.vlgmr.msra.gmra.mrb[28].mxu0 %vm184_vm2, %v679_v52 }
 0x560   :  { %3231 = vmatprep.mubr.msk.bf16.mxu0 %vm3621_vm1, %v3620_v15 }
 0x598   :  { %v771_v53 = vpop.f32.mrb[16].mxu0 }
 0x599   :  { %v3181_v54 = vpop.f32.mrb[17].mxu0 }
 0x59a   :  { %v774_v58 = vpop.f32.mrb[18].mxu0 }
 0x59b   :  { %v3182_v59 = vpop.f32.mrb[19].mxu0 }
 0x59c   :  { %v723_v62 = vpop.f32.mrb[20].mxu1 }
 0x59d   :  { %v3175_v63 = vpop.f32.mrb[21].mxu1 }
 0x59e   :  { %v726_v2 = vpop.f32.mrb[22].mxu1 }
 0x59f   :  { %v3176_v3 = vpop.f32.mrb[23].mxu1 }
 0x5f1   :  { %v819_v6 = vpop.f32.mrb[24].mxu1 }
 0x5f2   :  { %v3187_v7 = vpop.f32.mrb[25].mxu1 }
 0x5f3   :  { %v822_v8 = vpop.f32.mrb[26].mxu1 }
 0x5f4   :  { %v3188_v9 = vpop.f32.mrb[27].mxu1 }
 0x5f5   :  { %v867_v10 = vpop.f32.mrb[20].mxu0 }
 0x5f6   :  { %v3429_v60 = vpack.i.bf16 %v867_v10, %v819_v6  ;;  %v3193_v12 = vpop.f32.mrb[21].mxu0 }
 0x5f7   :  { %v870_v5 = vpop.f32.mrb[22].mxu0 }
 0x5f8   :  { %v3194_v57 = vpop.f32.mrb[23].mxu0  ;;  %3430 = vrot.lane.b32.xlu1 %v3429_v60, %s3627_s29 }
 0x5f9   :  { %v915_v11 = vpop.f32.mrb[28].mxu1 }
 0x5fa   :  { %v3199_v13 = vpop.f32.mrb[29].mxu1 }
 0x5fb   :  { %v918_v14 = vpop.f32.mrb[30].mxu1  ;;  %v3479_v13 = vld [vmem:[%s4418_s4 + $0x8] sm:$0xff]  }
 0x5fc   :  { %v3200_v16 = vpop.f32.mrb[31].mxu1 }
 0x601   :  { %v1011_v17 = vpop.f32.mrb[32].mxu1 }
 0x602   :  { %v3211_v18 = vpop.f32.mrb[33].mxu1 }
 0x603   :  { %v1014_v19 = vpop.f32.mrb[34].mxu1 }
 0x604   :  { %v3212_v20 = vpop.f32.mrb[35].mxu1 }
 0x62a   :  { %v963_v27 = vpop.f32.mrb[24].mxu0 }
 0x62b   :  { %v3434_v31 = vpack.i.bf16 %v963_v27, %v915_v11  ;;  %v3205_v32 = vpop.f32.mrb[25].mxu0  ;;  %v3478_v11 = vld [vmem:[%s4418_s4] sm:$0xff]  }
 0x62c   :  { %v966_v33 = vpop.f32.mrb[26].mxu0  ;;  %3228 = vmatpush3.bf16.msra.mxu0 %v3478_v11  ;;  %v1198_v32 = vsub.s32 3, %v3719_v24  ;;  %v1398_v11 = vsub.s32 5, %v3719_v24 }
 0x62d   :  { %v3206_v34 = vpop.f32.mrb[27].mxu0  ;;  %3435 = vrot.lane.b32.xlu0 %v3434_v31, %s3628_s14  ;;  %3229 = vmatprep.subr.bf16.mxu0 %v3620_v15 }
 0x630   :  { %3230 = vmatpush3.bf16.msra.mxu0 %v3479_v13  ;;  %v1399_v13 = vrot.slane %v3725_v26, %v1398_v11 }
 0x631   :  { %3255 = vmatprep.subr.bf16.mxu0 %v3620_v15 }
 0x632   :  { %v1059_v21 = vpop.f32.mrb[28].mxu0 }
 0x633   :  { %v3439_v36 = vpack.i.bf16 %v1059_v21, %v1011_v17  ;;  %v3217_v55 = vpop.f32.mrb[29].mxu0 }
 0x634   :  { %v1062_v4 = vpop.f32.mrb[30].mxu0 }
 0x635   :  { %v3218_v47 = vpop.f32.mrb[31].mxu0  ;;  %3440 = vrot.lane.b32.xlu1 %v3439_v36, %s3629_s15  ;;  %v1199_v36 = vrot.slane %v3725_v26, %v1198_v32 }
 0x66a   :  { %v3431_v56 = vpop.permute.xlu1 %3430 }
 0x66b   :  { %v3433_v35 = vunpack.i.h.bf16 %v3431_v56  ;;  %v3432_v37 = vunpack.i.l.bf16 %v3431_v56 }
 0x66d   :  { %v1090_v42 = vsel %vm184_vm2, %v771_v53, %v3433_v35  ;;  %v1089_v43 = vsel %vm184_vm2, %v723_v62, %v3432_v37  ;;  %v3481_v35 = vld [vmem:[%s4420_s6 + $0x8] sm:$0xff]   ;;  %v3482_v37 = vld [vmem:[%s4420_s6 + $0x10] sm:$0xff]  }
 0x69f   :  { %v3436_v28 = vpop.permute.xlu0 %3435 }
 0x6a0   :  { %v3438_v38 = vunpack.i.h.bf16 %v3436_v28  ;;  %v3437_v39 = vunpack.i.l.bf16 %v3436_v28  ;;  %v3480_v28 = vld [vmem:[%s4420_s6] sm:$0xff]  }
 0x6a2   :  { %v1093_v46 = vsel %vm1091_vm5, %v1090_v42, %v3438_v38  ;;  %v1092_v61 = vsel %vm1091_vm5, %v1089_v43, %v3437_v39  ;;  %v3483_v38 = vld [vmem:[%s4420_s6 + $0x18] sm:$0xff]   ;;  %v3484_v39 = vld [vmem:[%s4420_s6 + $0x20] sm:$0xff]   ;;  %v3486_v42 = vld [vmem:[%s4420_s6 + $0x30] sm:$0xff]  }
 0x6a3   :  { %v3487_v43 = vld [vmem:[%s4420_s6 + $0x38] sm:$0xff]  }
 0x6a7   :  { %v3441_v40 = vpop.permute.xlu1 %3440 }
 0x6a8   :  { %v3443_v44 = vunpack.i.h.bf16 %v3441_v40  ;;  %v3442_v45 = vunpack.i.l.bf16 %v3441_v40  ;;  %v3485_v40 = vld [vmem:[%s4420_s6 + $0x28] sm:$0xff]  }
 0x6aa   :  { %v1096_v49 = vsel %vm1094_vm6, %v1093_v46, %v3443_v44  ;;  %v1095_v41 = vsel %vm1094_vm6, %v1092_v61, %v3442_v45  ;;  %v2929_v44 = vld [vmem:[%s4419_s5] ss:$0 sm:$0xff] }
 0x6ab   :  { %v1097_v50 = vpack.c.bf16 %v1096_v49, %v1095_v41 }
 0x6ad   :  { %3224 = vmatmul.mubr.msk.bf16.vlgmr.msra.gmra.mrb[36].mxu1 %vm45_vm0, %v1097_v50 }
 0x6ae   :  { %3251 = vmatprep.mubr.msk.bf16.mxu1 %vm3621_vm1, %v3620_v15  ;;  %3236 = vmatpush3.bf16.msra.mxu1 %v3480_v28  ;;  %v3488_v28 = vld [vmem:[%s4415_s1 + $0x10] sm:$0xff]  }
 0x6af   :  { %3237 = vmatprep.subr.bf16.mxu1 %v3620_v15 }
 0x6b2   :  { %3238 = vmatpush3.bf16.msra.mxu1 %v3481_v35  ;;  %v3489_v35 = vld [vmem:[%s4415_s1 + $0x18] sm:$0xff]  }
 0x6b3   :  { %3239 = vmatprep.subr.bf16.mxu1 %v3620_v15 }
 0x6b6   :  { %3240 = vmatpush3.bf16.msra.mxu1 %v3482_v37 }
 0x6b7   :  { %3241 = vmatprep.subr.bf16.mxu1 %v3620_v15 }
 0x6ba   :  { %3242 = vmatpush3.bf16.msra.mxu1 %v3483_v38 }
 0x6bb   :  { %3243 = vmatprep.subr.bf16.mxu1 %v3620_v15 }
 0x6be   :  { %3244 = vmatpush3.bf16.msra.mxu1 %v3484_v39 }
 0x6bf   :  { %3245 = vmatprep.subr.bf16.mxu1 %v3620_v15 }
 0x6c2   :  { %3246 = vmatpush3.bf16.msra.mxu1 %v3485_v40 }
 0x6c3   :  { %3247 = vmatprep.subr.bf16.mxu1 %v3620_v15 }
 0x6c6   :  { %3248 = vmatpush3.bf16.msra.mxu1 %v3486_v42 }
 0x6c7   :  { %3249 = vmatprep.subr.bf16.mxu1 %v3620_v15 }
 0x6ca   :  { %3250 = vmatpush3.bf16.msra.mxu1 %v3487_v43 }
 0x6cb   :  { %3281 = vmatprep.subr.bf16.mxu1 %v3620_v15 }
 0x780   :  { %v1155_v52 = vpop.f32.mrb[36].mxu1 }
 0x781   :  { %v1156_v53 = vadd.f32 %v1155_v52, %v1105_v51  ;;  %v3225_v54 = vpop.f32.mrb[37].mxu1 }
 0x782   :  { %v1158_v58 = vpop.f32.mrb[38].mxu1 }
 0x783   :  { %v3973_v59 = vadd.f32 %v1156_v53, %v3689_v0  ;;  %v1159_v62 = vadd.f32 %v1158_v58, %v1105_v51  ;;  %v3226_v63 = vpop.f32.mrb[39].mxu1 }
 0x785   :  { %v3976_v2 = vadd.f32 %v1159_v62, %v3694_v1  ;;  %v1164_v3 = vsel %vm45_vm0, %v3973_v59, 0.0 }
 0x786   :  { %1165 = vadd.xlane.f32.xlu0 %v1164_v3 }
 0x787   :  { %v1167_v6 = vsel %vm45_vm0, %v3976_v2, 0.0 }
 0x788   :  { %1168 = vadd.xlane.f32.xlu1 %v1167_v6 }
 0x813   :  { %v1166_v7 = vpop.xlane.xlu0 %1165 }
 0x814   :  { %v1170_v8 = vmul.f32 0.03125, %v1166_v7 }
 0x815   :  { %v1169_v9 = vpop.xlane.xlu1 %1168 }
 0x816   :  { %v1172_v10 = vsub.f32 %v3973_v59, %v1170_v8  ;;  %v1171_v0 = vmul.f32 0.03125, %v1169_v9 }
 0x818   :  { %v1173_v60 = vsub.f32 %v3976_v2, %v1171_v0  ;;  %v1174_v12 = vmul.f32 %v1172_v10, %v1172_v10 }
 0x81a   :  { %v1176_v1 = vsel %vm45_vm0, %v1174_v12, 0.0  ;;  %v1175_v5 = vmul.f32 %v1173_v60, %v1173_v60 }
 0x81b   :  { %1177 = vadd.xlane.f32.xlu0 %v1176_v1 }
 0x81c   :  { %v1179_v57 = vsel %vm45_vm0, %v1175_v5, 0.0 }
 0x81f   :  { %1180 = vadd.xlane.f32.xlu0 %v1179_v57 }
 0x8a8   :  { %v1178_v14 = vpop.xlane.xlu0 %1177 }
 0x8a9   :  { %v1182_v16 = vmul.f32 0.03125, %v1178_v14 }
 0x8ab   :  { %v1184_v17 = vadd.f32 1e-05, %v1182_v16 }
 0x8ac   :  { %v1181_v18 = vpop.xlane.xlu0 %1180 }
 0x8ad   :  { %3540 = vrsqrt.f32 %v1184_v17  ;;  %v1183_v19 = vmul.f32 0.03125, %v1181_v18 }
 0x8af   :  { %v1185_v20 = vadd.f32 1e-05, %v1183_v19 }
 0x8b1   :  { %3542 = vrsqrt.f32 %v1185_v20 }
 0x8b7   :  { %v3541_v27 = vpop.eup %3540 }
 0x8b8   :  { %v1188_v31 = vmul.f32 %v3541_v27, %v1172_v10 }
 0x8ba   :  { %v1194_v34 = vmul.f32 %v1193_v29, %v1188_v31 }
 0x8bb   :  { %v3543_v33 = vpop.eup %3542 }
 0x8bc   :  { %v1189_v21 = vmul.f32 %v3543_v33, %v1173_v60  ;;  %v1200_v4 = vadd.f32 %v1199_v36, %v1194_v34 }
 0x8be   :  { %v1195_v55 = vmul.f32 %v1193_v29, %v1189_v21 }
 0x8c0   :  { %v1201_v47 = vadd.f32 %v1199_v36, %v1195_v55 }
 0x8c2   :  { %v1202_v56 = vpack.c.bf16 %v1201_v47, %v1200_v4 }
 0x8c4   :  { %3232 = vmatmul.mubr.msk.bf16.vlgmr.msra.gmra.mrb[32].mxu0 %vm45_vm0, %v1202_v56 }
 0x8c5   :  { %3259 = vmatprep.mubr.msk.bf16.mxu0 %vm3621_vm1, %v3620_v15  ;;  %3256 = vmatpush3.bf16.msra.mxu0 %v3488_v28 }
 0x8c6   :  { %3257 = vmatprep.subr.bf16.mxu0 %v3620_v15 }
 0x8c9   :  { %3258 = vmatpush3.bf16.msra.mxu0 %v3489_v35 }
 0x8ca   :  { %3263 = vmatprep.subr.bf16.mxu0 %v3620_v15 }
 0x997   :  { %v1263_v45 = vpop.f32.mrb[32].mxu0 }
 0x998   :  { %v1264_v46 = vadd.f32 %v2929_v44, %v1263_v45  ;;  %v3233_v61 = vpop.f32.mrb[33].mxu0 }
 0x999   :  { %v1266_v49 = vpop.f32.mrb[34].mxu0 }
 0x99a   :  { %v1272_v41 = vmul.f32 0.044715, %v1264_v46  ;;  %v1267_v50 = vadd.f32 %v2929_v44, %v1266_v49  ;;  %v3234_v51 = vpop.f32.mrb[35].mxu0  ;;  %v1270_v0 = vmul.f32 0.5, %v1264_v46  ;;  %v4071_v44 = vld [vmem:[%s4421_s7 + $0x8] sm:$0x3f] }
 0x99b   :  { %v1433_v45 = vrot.slane %v4071_v44, %v75_v25  ;;  %v2947_v25 = vld [vmem:[%s4416_s2 + $0x1] ss:$0 sm:$0xff] }
 0x99c   :  { %v1274_v52 = vmul.f32 %v1272_v41, %v1264_v46  ;;  %v1273_v53 = vmul.f32 0.044715, %v1267_v50  ;;  %v1271_v60 = vmul.f32 0.5, %v1267_v50  ;;  %v1439_v41 = vrot.slane %v4071_v44, %v81_v30 }
 0x99e   :  { %v1276_v54 = vmul.f32 %v1274_v52, %v1264_v46  ;;  %v1275_v58 = vmul.f32 %v1273_v53, %v1267_v50 }
 0x9a0   :  { %v1278_v62 = vadd.f32 %v1276_v54, %v1264_v46  ;;  %v1277_v63 = vmul.f32 %v1275_v58, %v1267_v50 }
 0x9a2   :  { %v1280_v3 = vmul.f32 0.7978846, %v1278_v62  ;;  %v1279_v6 = vadd.f32 %v1277_v63, %v1267_v50 }
 0x9a4   :  { %3544 = vtanh.f32 %v1280_v3  ;;  %v1281_v7 = vmul.f32 0.7978846, %v1279_v6 }
 0x9a6   :  { %3546 = vtanh.f32 %v1281_v7 }
 0x9ae   :  { %v3545_v8 = vpop.eup %3544 }
 0x9af   :  { %v1284_v9 = vadd.f32 1.0, %v3545_v8 }
 0x9b0   :  { %v3547_v10 = vpop.eup %3546 }
 0x9b1   :  { %v1285_v12 = vadd.f32 1.0, %v3547_v10  ;;  %v1286_v1 = vmul.f32 %v1284_v9, %v1270_v0 }
 0x9b3   :  { %v1287_v5 = vmul.f32 %v1285_v12, %v1271_v60 }
 0x9b5   :  { %v1288_v57 = vpack.c.bf16 %v1287_v5, %v1286_v1 }
 0x9b7   :  { %3252 = vmatmul.mubr.bf16.vlgmr.msra.gmra.mrb[40].mxu1 %v1288_v57 }
 0x9b8   :  { %3283 = vmatprep.mubr.msk.bf16.mxu1 %vm3621_vm1, %v3620_v15 }
 0xa8a   :  { %v1387_v14 = vpop.f32.mrb[40].mxu1 }
 0xa8b   :  { %v1394_v16 = vadd.f32 %v1387_v14, %v3973_v59  ;;  %v3253_v17 = vpop.f32.mrb[41].mxu1 }
 0xa8c   :  { %v1390_v18 = vpop.f32.mrb[42].mxu1 }
 0xa8d   :  { %v4047_v19 = vadd.f32 %v1399_v13, %v1394_v16  ;;  %v1395_v20 = vadd.f32 %v1390_v18, %v3976_v2  ;;  %v3254_v27 = vpop.f32.mrb[43].mxu1 }
 0xa8f   :  { %v4050_v29 = vadd.f32 %v1399_v13, %v1395_v20  ;;  %v1404_v31 = vsel %vm45_vm0, %v4047_v19, 0.0 }
 0xa90   :  { %1405 = vadd.xlane.f32.xlu0 %v1404_v31 }
 0xa91   :  { %v1407_v33 = vsel %vm45_vm0, %v4050_v29, 0.0 }
 0xa92   :  { %1408 = vadd.xlane.f32.xlu1 %v1407_v33 }
 0xb1d   :  { %v1406_v26 = vpop.xlane.xlu0 %1405 }
 0xb1e   :  { %v1410_v34 = vmul.f32 0.03125, %v1406_v26 }
 0xb1f   :  { %v1409_v59 = vpop.xlane.xlu1 %1408 }
 0xb20   :  { %v1412_v21 = vsub.f32 %v4047_v19, %v1410_v34  ;;  %v1411_v36 = vmul.f32 0.03125, %v1409_v59 }
 0xb22   :  { %v1413_v55 = vsub.f32 %v4050_v29, %v1411_v36  ;;  %v1414_v2 = vmul.f32 %v1412_v21, %v1412_v21 }
 0xb24   :  { %v1416_v4 = vsel %vm45_vm0, %v1414_v2, 0.0  ;;  %v1415_v47 = vmul.f32 %v1413_v55, %v1413_v55 }
 0xb25   :  { %1417 = vadd.xlane.f32.xlu0 %v1416_v4 }
 0xb26   :  { %v1419_v56 = vsel %vm45_vm0, %v1415_v47, 0.0 }
 0xb27   :  { %1420 = vadd.xlane.f32.xlu1 %v1419_v56 }
 0xbb2   :  { %v1418_v37 = vpop.xlane.xlu0 %1417 }
 0xbb3   :  { %v1422_v38 = vmul.f32 0.03125, %v1418_v37 }
 0xbb4   :  { %v1421_v39 = vpop.xlane.xlu1 %1420 }
 0xbb5   :  { %v1424_v40 = vadd.f32 1e-05, %v1422_v38  ;;  %v1423_v42 = vmul.f32 0.03125, %v1421_v39 }
 0xbb7   :  { %3548 = vrsqrt.f32 %v1424_v40  ;;  %v1425_v43 = vadd.f32 1e-05, %v1423_v42 }
 0xbb9   :  { %3550 = vrsqrt.f32 %v1425_v43 }
 0xbc1   :  { %v3549_v46 = vpop.eup %3548 }
 0xbc2   :  { %v1428_v61 = vmul.f32 %v3549_v46, %v1412_v21 }
 0xbc3   :  { %v3551_v49 = vpop.eup %3550 }
 0xbc4   :  { %v1434_v50 = vmul.f32 %v1433_v45, %v1428_v61  ;;  %v1429_v51 = vmul.f32 %v3551_v49, %v1413_v55 }
 0xbc6   :  { %v1435_v52 = vmul.f32 %v1433_v45, %v1429_v51  ;;  %v1440_v53 = vadd.f32 %v1439_v41, %v1434_v50 }
 0xbc8   :  { %v1441_v54 = vadd.f32 %v1439_v41, %v1435_v52 }
 0xbca   :  { %v1442_v58 = vpack.c.bf16 %v1441_v54, %v1440_v53 }
 0xbcc   :  { %3260 = vmatmul.mubr.msk.bf16.vlgmr.msra.gmra.mrb[36].mxu0 %vm45_vm0, %v1442_v58 }
 0xbcd   :  { %3265 = vmatprep.mubr.msk.bf16.mxu0 %vm3621_vm1, %v3620_v15 }
 0xc9f   :  { %v1505_v62 = vpop.f32.mrb[36].mxu0 }
 0xca0   :  { %v3261_v63 = vpop.f32.mrb[37].mxu0  ;;  %v1506_v6 = vadd.f32 %v2947_v25, %v1505_v62 }
 0xca1   :  { %v1508_v3 = vpop.f32.mrb[38].mxu0 }
 0xca2   :  { %v1509_v30 = vadd.f32 %v2947_v25, %v1508_v3  ;;  %v3262_v7 = vpop.f32.mrb[39].mxu0  ;;  %v1532_v10 = vpack.c.bf16 %v1506_v6, %v1506_v6 }
 0xca4   :  { %v3449_v8 = vpack.i.bf16 %v1509_v30, %v1506_v6  ;;  %v4087_v9 = vpack.c.bf16 %v1509_v30, %v1509_v30 }
 0xca6   :  { %3450 = vrot.lane.b32.xlu1 %v3449_v8, %s3622_s24  ;;  %3445 = vrot.lane.b32.xlu0 %v3449_v8, %s3623_s25 }
 0xcaa   :  { %3455 = vrot.lane.b32.xlu1 %v3449_v8, %s3624_s26  ;;  %1590 = vrot.lane.b32.xlu0 %v4087_v9, %s3625_s27 }
 0xcae   :  { %1541 = vrot.lane.b32.xlu1 %v1532_v10, %s3625_s27 }
 0xd18   :  { %v3451_v0 = vpop.permute.xlu1 %3450  ;;  %v3446_v60 = vpop.permute.xlu0 %3445 }
 0xd19   :  { %v3448_v12 = vunpack.i.h.bf16 %v3446_v60  ;;  %v3447_v1 = vunpack.i.l.bf16 %v3446_v60  ;;  %v3453_v5 = vunpack.i.h.bf16 %v3451_v0  ;;  %v3452_v57 = vunpack.i.l.bf16 %v3451_v0 }
 0xd1b   :  { %v4093_v13 = vpack.c.bf16 %v3448_v12, %v3448_v12  ;;  %v4095_v14 = vpack.c.bf16 %v3447_v1, %v3447_v1  ;;  %v4101_v17 = vpack.c.bf16 %v3453_v5, %v3453_v5  ;;  %v4103_v18 = vpack.c.bf16 %v3452_v57, %v3452_v57 }
 0xd1c   :  { %v3456_v16 = vpop.permute.xlu1 %3455  ;;  %v1591_v59 = vpop.permute.xlu0 %1590 }
 0xd1d   :  { %1639 = vrot.lane.b32.xlu1 %v4095_v14, %s3625_s27  ;;  %1688 = vrot.lane.b32.xlu0 %v4093_v13, %s3625_s27  ;;  %v3458_v20 = vunpack.i.h.bf16 %v3456_v16  ;;  %v3457_v27 = vunpack.i.l.bf16 %v3456_v16  ;;  %v1596_v21 = vsel %vm184_vm2, %v1591_v59, 0 }
 0xd1f   :  { %v4110_v26 = vpack.c.bf16 %v3458_v20, %v3458_v20  ;;  %v4112_v34 = vpack.c.bf16 %v3457_v27, %v3457_v27 }
 0xd20   :  { %v1542_v31 = vpop.permute.xlu1 %1541 }
 0xd21   :  { %v1547_v33 = vsel %vm184_vm2, %v1542_v31, 0  ;;  %1737 = vrot.lane.b32.xlu1 %v4103_v18, %s3625_s27  ;;  %1786 = vrot.lane.b32.xlu0 %v4101_v17, %s3625_s27 }
 0xd22   :  { %3264 = vmatpush3.bf16.xpose.msra.mxu0 %v1547_v33 }
 0xd23   :  { %3269 = vmatprep.subr.bf16.mxu0 %v3620_v15 }
 0xd25   :  { %1835 = vrot.lane.b32.xlu1 %v4112_v34, %s3625_s27  ;;  %1884 = vrot.lane.b32.xlu0 %v4110_v26, %s3625_s27  ;;  %s3630_s27 = smov [#allocation2]  }
 0xd29   :  { %3266 = vmatmul.mubr.msk.bf16.vlgmr.msra.gmra.mrb[40].mxu0 %vm184_vm2, %v1532_v10  ;;  %2036 = vrot.lane.b32.xlu1 %v1532_v10, %s3626_s28 }
 0xd2a   :  { %3270 = vmatpush3.bf16.xpose.msra.mxu0 %v1596_v21  ;;  %3271 = vmatprep.mubr.msk.bf16.mxu0 %vm3621_vm1, %v3620_v15 }
 0xd2b   :  { %3275 = vmatprep.subr.bf16.mxu0 %v3620_v15 }
 0xd31   :  { %3272 = vmatmul.mubr.msk.bf16.vlgmr.msra.gmra.mrb[44].mxu0 %vm184_vm2, %v4087_v9 }
 0xd32   :  { %3277 = vmatprep.mubr.msk.bf16.mxu0 %vm3621_vm1, %v3620_v15 }
 0xd8f   :  { %v1640_v36 = vpop.permute.xlu1 %1639  ;;  %v1689_v55 = vpop.permute.xlu0 %1688 }
 0xd90   :  { %v1645_v2 = vsel %vm184_vm2, %v1640_v36, 0  ;;  %v1694_v4 = vsel %vm184_vm2, %v1689_v55, 0 }
 0xd91   :  { %3276 = vmatpush3.bf16.xpose.msra.mxu0 %v1645_v2  ;;  %3282 = vmatpush3.bf16.xpose.msra.mxu1 %v1694_v4 }
 0xd92   :  { %3287 = vmatprep.subr.bf16.mxu0 %v3620_v15  ;;  %3293 = vmatprep.subr.bf16.mxu1 %v3620_v15 }
 0xd93   :  { %v1738_v47 = vpop.permute.xlu1 %1737  ;;  %v1787_v56 = vpop.permute.xlu0 %1786 }
 0xd94   :  { %v1743_v28 = vsel %vm184_vm2, %v1738_v47, 0  ;;  %v1792_v35 = vsel %vm184_vm2, %v1787_v56, 0 }
 0xd97   :  { %v1836_v37 = vpop.permute.xlu1 %1835  ;;  %v1885_v38 = vpop.permute.xlu0 %1884 }
 0xd98   :  { %3278 = vmatmul.mubr.msk.bf16.vlgmr.msra.gmra.mrb[48].mxu0 %vm184_vm2, %v4095_v14  ;;  %3284 = vmatmul.mubr.msk.bf16.vlgmr.msra.gmra.mrb[44].mxu1 %vm184_vm2, %v4093_v13  ;;  %v1841_v39 = vsel %vm184_vm2, %v1836_v37, 0  ;;  %v1890_v40 = vsel %vm184_vm2, %v1885_v38, 0 }
 0xd99   :  { %3288 = vmatpush3.bf16.xpose.msra.mxu0 %v1743_v28  ;;  %3294 = vmatpush3.bf16.xpose.msra.mxu1 %v1792_v35 }
 0xd9a   :  { %3289 = vmatprep.mubr.msk.bf16.mxu0 %vm3621_vm1, %v3620_v15  ;;  %3295 = vmatprep.mubr.msk.bf16.mxu1 %vm3621_vm1, %v3620_v15 }
 0xd9b   :  { %3299 = vmatprep.subr.bf16.mxu0 %v3620_v15  ;;  %3305 = vmatprep.subr.bf16.mxu1 %v3620_v15  ;;  %v2037_v42 = vpop.permute.xlu1 %2036 }
 0xd9c   :  { %v2042_v43 = vsel %vm685_vm3, %v2037_v42, 0 }
 0xda0   :  { %3290 = vmatmul.mubr.msk.bf16.vlgmr.msra.gmra.mrb[52].mxu0 %vm184_vm2, %v4103_v18  ;;  %3296 = vmatmul.mubr.msk.bf16.vlgmr.msra.gmra.mrb[48].mxu1 %vm184_vm2, %v4101_v17 }
 0xda1   :  { %3300 = vmatpush3.bf16.xpose.msra.mxu0 %v1841_v39  ;;  %3306 = vmatpush3.bf16.xpose.msra.mxu1 %v1890_v40 }
 0xda2   :  { %3301 = vmatprep.mubr.msk.bf16.mxu0 %vm3621_vm1, %v3620_v15  ;;  %3307 = vmatprep.mubr.msk.bf16.mxu1 %vm3621_vm1, %v3620_v15 }
 0xda3   :  { %3311 = vmatprep.subr.bf16.mxu0 %v3620_v15  ;;  %3317 = vmatprep.subr.bf16.mxu1 %v3620_v15 }
 0xda8   :  { %3302 = vmatmul.mubr.msk.bf16.vlgmr.msra.gmra.mrb[56].mxu0 %vm184_vm2, %v4112_v34  ;;  %3308 = vmatmul.mubr.msk.bf16.vlgmr.msra.gmra.mrb[52].mxu1 %vm184_vm2, %v4110_v26 }
 0xda9   :  { %3312 = vmatpush3.bf16.msra.mxu0 %v2042_v43  ;;  %3319 = vmatprep.mubr.msk.bf16.mxu1 %vm3621_vm1, %v3620_v15 }
 0xdaa   :  { %3313 = vmatprep.mubr.msk.bf16.mxu0 %vm3621_vm1, %v3620_v15  ;;  %3323 = vmatprep.subr.bf16.mxu0 %v3620_v15 }
 0xdfc   :  { %v1583_v45 = vpop.f32.mrb[40].mxu0 }
 0xdfd   :  { %v4169_v46 = vsel %vm3824_vm4, %v1583_v45, -1e+30  ;;  %v3267_v61 = vpop.f32.mrb[41].mxu0 }
 0xdfe   :  { %v1586_v49 = vpop.f32.mrb[42].mxu0  ;;  %v1940_v41 = vsel %vm184_vm2, %v4169_v46, -inf }
 0xdff   :  { %1941 = vmax.xlane.f32.xlu1 %v1940_v41  ;;  %v3268_v50 = vpop.f32.mrb[43].mxu0 }
 0xe04   :  { %v1632_v51 = vpop.f32.mrb[44].mxu0 }
 0xe05   :  { %v1933_v52 = vsel %vm3824_vm4, %v1632_v51, -1e+30  ;;  %v3273_v53 = vpop.f32.mrb[45].mxu0 }
 0xe06   :  { %v1635_v54 = vpop.f32.mrb[46].mxu0  ;;  %v1943_v58 = vsel %vm184_vm2, %v1933_v52, -inf }
 0xe07   :  { %1944 = vmax.xlane.f32.xlu0 %v1943_v58  ;;  %v3274_v25 = vpop.f32.mrb[47].mxu0 }
 0xe6b   :  { %v1681_v62 = vpop.f32.mrb[48].mxu0  ;;  %v1730_v63 = vpop.f32.mrb[44].mxu1 }
 0xe6c   :  { %v1934_v3 = vsel %vm3824_vm4, %v1681_v62, -1e+30  ;;  %v3279_v6 = vpop.f32.mrb[49].mxu0  ;;  %v3285_v30 = vpop.f32.mrb[45].mxu1  ;;  %v1935_v0 = vsel %vm3824_vm4, %v1730_v63, -1e+30 }
 0xe6d   :  { %v1684_v7 = vpop.f32.mrb[50].mxu0  ;;  %v1733_v8 = vpop.f32.mrb[46].mxu1  ;;  %v1946_v10 = vsel %vm184_vm2, %v1934_v3, -inf  ;;  %v1949_v1 = vsel %vm184_vm2, %v1935_v0, -inf }
 0xe6e   :  { %1947 = vmax.xlane.f32.xlu0 %v1946_v10  ;;  %v3280_v60 = vpop.f32.mrb[51].mxu0  ;;  %v3286_v12 = vpop.f32.mrb[47].mxu1 }
 0xe72   :  { %1950 = vmax.xlane.f32.xlu0 %v1949_v1 }
 0xe73   :  { %v1779_v5 = vpop.f32.mrb[52].mxu0  ;;  %v1828_v57 = vpop.f32.mrb[48].mxu1 }
 0xe74   :  { %v1936_v16 = vsel %vm3824_vm4, %v1779_v5, -1e+30  ;;  %v4186_v20 = vsel %vm3824_vm4, %v1828_v57, -1e+30  ;;  %v3291_v27 = vpop.f32.mrb[53].mxu0  ;;  %v3297_v31 = vpop.f32.mrb[49].mxu1 }
 0xe75   :  { %v1782_v33 = vpop.f32.mrb[54].mxu0  ;;  %v1831_v59 = vpop.f32.mrb[50].mxu1  ;;  %v1952_v21 = vsel %vm184_vm2, %v1936_v16, -inf  ;;  %v1955_v36 = vsel %vm184_vm2, %v4186_v20, -inf }
 0xe76   :  { %1953 = vmax.xlane.f32.xlu1 %v1952_v21  ;;  %v3292_v55 = vpop.f32.mrb[55].mxu0  ;;  %1956 = vmax.xlane.f32.xlu0 %v1955_v36  ;;  %v3298_v2 = vpop.f32.mrb[51].mxu1 }
 0xe7b   :  { %v1877_v4 = vpop.f32.mrb[56].mxu0  ;;  %v1926_v47 = vpop.f32.mrb[52].mxu1 }
 0xe7c   :  { %v1938_v56 = vsel %vm3824_vm4, %v1877_v4, -1e+30  ;;  %v4195_v28 = vsel %vm3824_vm4, %v1926_v47, -1e+30  ;;  %v3303_v35 = vpop.f32.mrb[57].mxu0  ;;  %v3309_v37 = vpop.f32.mrb[53].mxu1 }
 0xe7d   :  { %v1880_v38 = vpop.f32.mrb[58].mxu0  ;;  %v1929_v39 = vpop.f32.mrb[54].mxu1  ;;  %v1958_v40 = vsel %vm184_vm2, %v1938_v56, -inf  ;;  %v1961_v42 = vsel %vm184_vm2, %v4195_v28, -inf }
 0xe7e   :  { %1959 = vmax.xlane.f32.xlu1 %v1958_v40  ;;  %v3304_v43 = vpop.f32.mrb[59].mxu0  ;;  %1962 = vmax.xlane.f32.xlu0 %v1961_v42  ;;  %v3310_v45 = vpop.f32.mrb[55].mxu1 }
 0xe8c   :  { %v1942_v49 = vpop.xlane.xlu1 %1941 }
 0xe8d   :  { %v1964_v41 = vsub.f32 %v4169_v46, %v1942_v49 }
 0xe8f   :  { %2132 = vrot.lane.b32.xlu1 %v4095_v14, %s3626_s28  ;;  %v1972_v51 = vmul.f32 1.442695, %v1964_v41 }
 0xe93   :  { %2180 = vrot.lane.b32.xlu1 %v4093_v13, %s3626_s28 }
 0xe94   :  { %2084 = vrot.lane.b32.xlu0 %v4087_v9, %s3626_s28  ;;  %v1945_v23 = vpop.xlane.xlu0 %1944 }
 0xe95   :  { %v1965_v61 = vsub.f32 %v1933_v52, %v1945_v23 }
 0xe97   :  { %v1974_v50 = vmul.f32 1.442695, %v1965_v61 }
 0xe99   :  { %3552 = vpow2.f32 %v1974_v50 }
 0xe9a   :  { %3554 = vpow2.f32 %v1972_v51 }
 0xea3   :  { %v3553_v53 = vpop.eup %3552 }
 0xea4   :  { %v1991_v54 = vsel %vm184_vm2, %v3553_v53, 0.0  ;;  %v4208_v58 = vpop.eup %3554 }
 0xea5   :  { %v1988_v13 = vsel %vm184_vm2, %v4208_v58, 0.0 }
 0xeb3   :  { %1992 = vadd.xlane.f32.xlu0 %v1991_v54 }
 0xeb7   :  { %1989 = vadd.xlane.f32.xlu1 %v1988_v13 }
 0xec8   :  { %2228 = vrot.lane.b32.xlu1 %v4103_v18, %s3626_s28 }
 0xefb   :  { %v1948_v9 = vpop.xlane.xlu0 %1947 }
 0xefc   :  { %v1966_v14 = vsub.f32 %v1934_v3, %v1948_v9 }
 0xefe   :  { %v1976_v46 = vmul.f32 1.442695, %v1966_v14 }
 0xeff   :  { %v1951_v52 = vpop.xlane.xlu0 %1950 }
 0xf00   :  { %3556 = vpow2.f32 %v1976_v46  ;;  %v1967_v25 = vsub.f32 %v1935_v0, %v1951_v52 }
 0xf02   :  { %v1978_v62 = vmul.f32 1.442695, %v1967_v25 }
 0xf03   :  { %v1954_v63 = vpop.xlane.xlu1 %1953  ;;  %v1957_v7 = vpop.xlane.xlu0 %1956 }
 0xf04   :  { %3558 = vpow2.f32 %v1978_v62  ;;  %v1968_v6 = vsub.f32 %v1936_v16, %v1954_v63  ;;  %v1969_v59 = vsub.f32 %v4186_v20, %v1957_v7 }
 0xf06   :  { %v1980_v30 = vmul.f32 1.442695, %v1968_v6  ;;  %v1982_v21 = vmul.f32 1.442695, %v1969_v59 }
 0xf08   :  { %3560 = vpow2.f32 %v1980_v30 }
 0xf0a   :  { %v4214_v8 = vpop.eup %3556 }
 0xf0b   :  { %v1960_v10 = vpop.xlane.xlu1 %1959  ;;  %v1963_v60 = vpop.xlane.xlu0 %1962  ;;  %v1994_v18 = vsel %vm184_vm2, %v4214_v8, 0.0 }
 0xf0c   :  { %v1970_v12 = vsub.f32 %v1938_v56, %v1960_v10  ;;  %1995 = vadd.xlane.f32.xlu1 %v1994_v18  ;;  %v1971_v36 = vsub.f32 %v4195_v28, %v1963_v60 }
 0xf0e   :  { %v4218_v3 = vpop.eup %3558  ;;  %v1984_v1 = vmul.f32 1.442695, %v1970_v12  ;;  %v1986_v55 = vmul.f32 1.442695, %v1971_v36 }
 0xf0f   :  { %v2085_v0 = vpop.permute.xlu0 %2084  ;;  %v1997_v5 = vsel %vm184_vm2, %v4218_v3, 0.0  ;;  %v2133_v2 = vpop.permute.xlu1 %2132 }
 0xf10   :  { %3562 = vpow2.f32 %v1984_v1  ;;  %v2090_v57 = vsel %vm685_vm3, %v2085_v0, 0  ;;  %1998 = vadd.xlane.f32.xlu0 %v1997_v5  ;;  %v2138_v45 = vsel %vm685_vm3, %v2133_v2, 0 }
 0xf11   :  { %3318 = vmatpush3.bf16.msra.mxu1 %v2090_v57  ;;  %3564 = vpow2.f32 %v1982_v21 }
 0xf12   :  { %v4223_v16 = vpop.eup %3560  ;;  %3329 = vmatprep.subr.bf16.mxu1 %v3620_v15  ;;  %3566 = vpow2.f32 %v1986_v55 }
 0xf13   :  { %v2000_v27 = vsel %vm184_vm2, %v4223_v16, 0.0  ;;  %v2181_v4 = vpop.permute.xlu1 %2180 }
 0xf14   :  { %2001 = vadd.xlane.f32.xlu1 %v2000_v27  ;;  %v2186_v40 = vsel %vm685_vm3, %v2181_v4, 0 }
 0xf1a   :  { %v4228_v31 = vpop.eup %3562 }
 0xf1b   :  { %v2006_v33 = vsel %vm184_vm2, %v4228_v31, 0.0  ;;  %v4238_v56 = vpop.eup %3564 }
 0xf1c   :  { %2007 = vadd.xlane.f32.xlu1 %v2006_v33  ;;  %v4242_v37 = vpop.eup %3566 }
 0xf26   :  { %2276 = vrot.lane.b32.xlu0 %v4101_v17, %s3626_s28  ;;  %v2003_v17 = vsel %vm184_vm2, %v4238_v56, 0.0 }
 0xf2d   :  { %2324 = vrot.lane.b32.xlu1 %v4112_v34, %s3626_s28  ;;  %v2009_v34 = vsel %vm184_vm2, %v4242_v37, 0.0 }
 0xf40   :  { %v1993_v47 = vpop.xlane.xlu0 %1992 }
 0xf41   :  { %3568 = vrcp.f32 %v1993_v47 }
 0xf44   :  { %v1990_v35 = vpop.xlane.xlu1 %1989 }
 0xf45   :  { %3570 = vrcp.f32 %v1990_v35  ;;  %2004 = vadd.xlane.f32.xlu0 %v2003_v17 }
 0xf48   :  { %v2229_v23 = vpop.permute.xlu1 %2228 }
 0xf49   :  { %2010 = vadd.xlane.f32.xlu0 %v2009_v34 }
 0xf4b   :  { %v3569_v20 = vpop.eup %3568 }
 0xf4c   :  { %v2021_v28 = vmul.f32 %v3569_v20, %v3553_v53 }
 0xf4e   :  { %v2029_v38 = vpack.c.bf16 %v2021_v28, %v2021_v28 }
 0xf4f   :  { %v3571_v39 = vpop.eup %3570 }
 0xf50   :  { %v2020_v42 = vmul.f32 %v3571_v39, %v4208_v58  ;;  %3320 = vmatmul.mubr.msk.bf16.vlgmr.msra.gmra.mrb[56].mxu1 %vm184_vm2, %v2029_v38  ;;  %v2234_v58 = vsel %vm685_vm3, %v2229_v23, 0 }
 0xf51   :  { %3330 = vmatpush3.bf16.msra.mxu1 %v2186_v40  ;;  %3331 = vmatprep.mubr.msk.bf16.mxu1 %vm3621_vm1, %v3620_v15 }
 0xf52   :  { %v2028_v43 = vpack.c.bf16 %v2020_v42, %v2020_v42  ;;  %3341 = vmatprep.subr.bf16.mxu1 %v3620_v15 }
 0xf54   :  { %3314 = vmatmul.mubr.msk.bf16.vlgmr.msra.gmra.mrb[60].mxu0 %vm184_vm2, %v2028_v43 }
 0xf55   :  { %3324 = vmatpush3.bf16.msra.mxu0 %v2138_v45  ;;  %3325 = vmatprep.mubr.msk.bf16.mxu0 %vm3621_vm1, %v3620_v15 }
 0xf56   :  { %3335 = vmatprep.subr.bf16.mxu0 %v3620_v15 }
 0xf5f   :  { %2372 = vrot.lane.b32.xlu0 %v4110_v26, %s3626_s28  ;;  %s2898_s28 = sshll.u32 %s3630_s27, 4  ;;  %s2899_s28 = int_to_ptr.vmem [resolvable:$true] %s2898_s28 }
 0xf60   :  { %p3601_p1 = scmp.lt.s32.totalorder %s2899_s28, %s2899_s28 }
 0xf99   :  { %v1996_v61 = vpop.xlane.xlu1 %1995 }
 0xf9a   :  { %3572 = vrcp.f32 %v1996_v61 }
 0xf9d   :  { %v1999_v49 = vpop.xlane.xlu0 %1998 }
 0xf9e   :  { %3574 = vrcp.f32 %v1999_v49  ;;  %v3490_v49 = vld [vmem:[%s4417_s3 + $0x10] sm:$0xff]  }
 0xfa1   :  { %v2002_v41 = vpop.xlane.xlu1 %2001  ;;  %v2277_v26 = vpop.permute.xlu0 %2276 }
 0xfa2   :  { %3576 = vrcp.f32 %v2002_v41  ;;  %v2282_v25 = vsel %vm685_vm3, %v2277_v26, 0 }
 0xfa4   :  { %v3573_v50 = vpop.eup %3572 }
 0xfa5   :  { %v2022_v51 = vmul.f32 %v3573_v50, %v4214_v8  ;;  %v3491_v50 = vld [vmem:[%s4417_s3 + $0x18] sm:$0xff]  }
 0xfa7   :  { %v2030_v53 = vpack.c.bf16 %v2022_v51, %v2022_v51 }
 0xfa8   :  { %v3575_v54 = vpop.eup %3574 }
 0xfa9   :  { %v2023_v13 = vmul.f32 %v3575_v54, %v4218_v3  ;;  %3326 = vmatmul.mubr.msk.bf16.vlgmr.msra.gmra.mrb[64].mxu0 %vm184_vm2, %v2030_v53  ;;  %v2008_v9 = vpop.xlane.xlu1 %2007 }
 0xfaa   :  { %3336 = vmatpush3.bf16.msra.mxu0 %v2234_v58  ;;  %3578 = vrcp.f32 %v2008_v9  ;;  %3337 = vmatprep.mubr.msk.bf16.mxu0 %vm3621_vm1, %v3620_v15 }
 0xfab   :  { %v2031_v14 = vpack.c.bf16 %v2023_v13, %v2023_v13  ;;  %3347 = vmatprep.subr.bf16.mxu0 %v3620_v15 }
 0xfac   :  { %v3577_v46 = vpop.eup %3576 }
 0xfad   :  { %v2024_v52 = vmul.f32 %v3577_v46, %v4223_v16  ;;  %3332 = vmatmul.mubr.msk.bf16.vlgmr.msra.gmra.mrb[60].mxu1 %vm184_vm2, %v2031_v14  ;;  %v2325_v62 = vpop.permute.xlu1 %2324 }
 0xfae   :  { %3342 = vmatpush3.bf16.msra.mxu1 %v2282_v25  ;;  %3343 = vmatprep.mubr.msk.bf16.mxu1 %vm3621_vm1, %v3620_v15  ;;  %v2330_v6 = vsel %vm685_vm3, %v2325_v62, 0 }
 0xfaf   :  { %v2032_v63 = vpack.c.bf16 %v2024_v52, %v2024_v52  ;;  %3353 = vmatprep.subr.bf16.mxu1 %v3620_v15 }
 0xfb1   :  { %3338 = vmatmul.mubr.msk.bf16.vlgmr.msra.gmra.mrb[68].mxu0 %vm184_vm2, %v2032_v63 }
 0xfb2   :  { %3348 = vmatpush3.bf16.msra.mxu0 %v2330_v6  ;;  %3349 = vmatprep.mubr.msk.bf16.mxu0 %vm3621_vm1, %v3620_v15 }
 0xfb3   :  { %3359 = vmatprep.subr.bf16.mxu0 %v3620_v15 }
 0xfb4   :  { %v3579_v30 = vpop.eup %3578 }
 0xfb5   :  { %v2026_v7 = vmul.f32 %v3579_v30, %v4228_v31 }
 0xfb7   :  { %v2034_v8 = vpack.c.bf16 %v2026_v7, %v2026_v7 }
 0xfb9   :  { %3350 = vmatmul.mubr.msk.bf16.vlgmr.msra.gmra.mrb[72].mxu0 %vm184_vm2, %v2034_v8 }
 0xfba   :  { %3363 = vmatprep.mubr.msk.bf16.mxu0 %vm3621_vm1, %v3620_v15  ;;  %3360 = vmatpush3.bf16.msra.mxu0 %v3490_v49  ;;  %v2547_v49 = vrot.slane %v4071_v44, %v1192_v22  ;;  %v3494_v22 = vld [vmem:[%s4420_s6 + $0x40] sm:$0xff]  }
 0xfbb   :  { %3361 = vmatprep.subr.bf16.mxu0 %v3620_v15 }
 0xfbe   :  { %3362 = vmatpush3.bf16.msra.mxu0 %v3491_v50 }
 0xfbf   :  { %3375 = vmatprep.subr.bf16.mxu0 %v3620_v15 }
 0xfd2   :  { %v2005_v10 = vpop.xlane.xlu0 %2004 }
 0xfd3   :  { %3580 = vrcp.f32 %v2005_v10 }
 0xfd6   :  { %v2011_v60 = vpop.xlane.xlu0 %2010 }
 0xfd7   :  { %3582 = vrcp.f32 %v2011_v60 }
 0xfda   :  { %v2373_v3 = vpop.permute.xlu0 %2372 }
 0xfdb   :  { %v2378_v5 = vsel %vm685_vm3, %v2373_v3, 0 }
 0xfdd   :  { %v3581_v18 = vpop.eup %3580 }
 0xfde   :  { %v2025_v12 = vmul.f32 %v3581_v18, %v4238_v56 }
 0xfe0   :  { %v2033_v1 = vpack.c.bf16 %v2025_v12, %v2025_v12 }
 0xfe1   :  { %v3583_v0 = vpop.eup %3582 }
 0xfe2   :  { %3344 = vmatmul.mubr.msk.bf16.vlgmr.msra.gmra.mrb[64].mxu1 %vm184_vm2, %v2033_v1  ;;  %v2027_v57 = vmul.f32 %v3583_v0, %v4242_v37 }
 0xfe3   :  { %3354 = vmatpush3.bf16.msra.mxu1 %v2378_v5  ;;  %3355 = vmatprep.mubr.msk.bf16.mxu1 %vm3621_vm1, %v3620_v15 }
 0xfe4   :  { %3367 = vmatprep.subr.bf16.mxu1 %v3620_v15  ;;  %v2035_v16 = vpack.c.bf16 %v2027_v57, %v2027_v57  ;;  %v2459_v57 = vrot.slane %v4071_v44, %v1104_v48 }
 0xfea   :  { %3356 = vmatmul.mubr.msk.bf16.vlgmr.msra.gmra.mrb[68].mxu1 %vm184_vm2, %v2035_v16 }
 0xfeb   :  { %3371 = vmatprep.mubr.msk.bf16.mxu1 %vm3621_vm1, %v3620_v15 }
0x1023   :  { %v2126_v27 = vpop.f32.mrb[56].mxu1 }
0x1024   :  { %v3321_v31 = vpop.f32.mrb[57].mxu1 }
0x1025   :  { %v2129_v33 = vpop.f32.mrb[58].mxu1 }
0x1026   :  { %v3322_v59 = vpop.f32.mrb[59].mxu1 }
0x1027   :  { %v2078_v21 = vpop.f32.mrb[60].mxu0 }
0x1028   :  { %v3315_v36 = vpop.f32.mrb[61].mxu0 }
0x1029   :  { %v2081_v55 = vpop.f32.mrb[62].mxu0 }
0x102a   :  { %v3316_v2 = vpop.f32.mrb[63].mxu0 }
0x107c   :  { %v2174_v4 = vpop.f32.mrb[64].mxu0 }
0x107d   :  { %v3327_v47 = vpop.f32.mrb[65].mxu0 }
0x107e   :  { %v2177_v56 = vpop.f32.mrb[66].mxu0 }
0x107f   :  { %v3328_v35 = vpop.f32.mrb[67].mxu0 }
0x1080   :  { %v2222_v17 = vpop.f32.mrb[60].mxu1 }
0x1081   :  { %v3459_v37 = vpack.i.bf16 %v2222_v17, %v2174_v4  ;;  %v3333_v34 = vpop.f32.mrb[61].mxu1 }
0x1082   :  { %v2225_v20 = vpop.f32.mrb[62].mxu1 }
0x1083   :  { %3460 = vrot.lane.b32.xlu1 %v3459_v37, %s3627_s29  ;;  %v3334_v28 = vpop.f32.mrb[63].mxu1 }
0x1084   :  { %v2270_v38 = vpop.f32.mrb[68].mxu0  ;;  %v3492_v28 = vld [vmem:[%s4418_s4 + $0x10] sm:$0xff]  }
0x1085   :  { %v3339_v39 = vpop.f32.mrb[69].mxu0  ;;  %3368 = vmatpush3.bf16.msra.mxu1 %v3492_v28 }
0x1086   :  { %v2273_v40 = vpop.f32.mrb[70].mxu0  ;;  %3369 = vmatprep.subr.bf16.mxu1 %v3620_v15 }
0x1087   :  { %v3340_v42 = vpop.f32.mrb[71].mxu0 }
0x108c   :  { %v2366_v43 = vpop.f32.mrb[72].mxu0 }
0x108d   :  { %v3351_v45 = vpop.f32.mrb[73].mxu0 }
0x108e   :  { %v2369_v23 = vpop.f32.mrb[74].mxu0 }
0x108f   :  { %v3352_v61 = vpop.f32.mrb[75].mxu0 }
0x10b5   :  { %v2318_v41 = vpop.f32.mrb[64].mxu1 }
0x10b6   :  { %v3464_v51 = vpack.i.bf16 %v2318_v41, %v2270_v38  ;;  %v3345_v53 = vpop.f32.mrb[65].mxu1  ;;  %v3493_v38 = vld [vmem:[%s4418_s4 + $0x18] sm:$0xff]  }
0x10b7   :  { %v2321_v54 = vpop.f32.mrb[66].mxu1  ;;  %3370 = vmatpush3.bf16.msra.mxu1 %v3493_v38 }
0x10b8   :  { %3465 = vrot.lane.b32.xlu0 %v3464_v51, %s3628_s14  ;;  %v3346_v58 = vpop.f32.mrb[67].mxu1  ;;  %3395 = vmatprep.subr.bf16.mxu1 %v3620_v15  ;;  %v2553_v54 = vrot.slane %v4071_v44, %v1198_v32  ;;  %v3495_v32 = vld [vmem:[%s4420_s6 + $0x48] sm:$0xff]  }
0x10bd   :  { %v2414_v13 = vpop.f32.mrb[68].mxu1 }
0x10be   :  { %v3469_v9 = vpack.i.bf16 %v2414_v13, %v2366_v43  ;;  %v3357_v26 = vpop.f32.mrb[69].mxu1 }
0x10bf   :  { %v2417_v14 = vpop.f32.mrb[70].mxu1 }
0x10c0   :  { %3470 = vrot.lane.b32.xlu1 %v3469_v9, %s3629_s15  ;;  %v3358_v46 = vpop.f32.mrb[71].mxu1  ;;  %v3496_v14 = vld [vmem:[%s4420_s6 + $0x50] sm:$0xff]  }
0x10c1   :  { %v3497_v46 = vld [vmem:[%s4420_s6 + $0x58] sm:$0xff]  }
0x10f5   :  { %v3461_v52 = vpop.permute.xlu1 %3460 }
0x10f6   :  { %v3463_v62 = vunpack.i.h.bf16 %v3461_v52  ;;  %v3462_v63 = vunpack.i.l.bf16 %v3461_v52  ;;  %v3498_v52 = vld [vmem:[%s4420_s6 + $0x60] sm:$0xff]  }
0x10f8   :  { %v2445_v8 = vsel %vm184_vm2, %v2126_v27, %v3463_v62  ;;  %v2444_v10 = vsel %vm184_vm2, %v2078_v21, %v3462_v63  ;;  %v3500_v62 = vld [vmem:[%s4420_s6 + $0x70] sm:$0xff]   ;;  %v3501_v63 = vld [vmem:[%s4420_s6 + $0x78] sm:$0xff]  }
0x112a   :  { %v3466_v25 = vpop.permute.xlu0 %3465 }
0x112b   :  { %v3468_v6 = vunpack.i.h.bf16 %v3466_v25  ;;  %v3467_v30 = vunpack.i.l.bf16 %v3466_v25  ;;  %v3499_v25 = vld [vmem:[%s4420_s6 + $0x68] sm:$0xff]  }
0x112d   :  { %v2447_v12 = vsel %vm1091_vm5, %v2445_v8, %v3468_v6  ;;  %v2446_v3 = vsel %vm1091_vm5, %v2444_v10, %v3467_v30  ;;  %v2979_v6 = vld [vmem:[%s4419_s5 + $0x1] ss:$0 sm:$0xff] }
0x1132   :  { %v3471_v7 = vpop.permute.xlu1 %3470 }
0x1133   :  { %v3473_v60 = vunpack.i.h.bf16 %v3471_v7  ;;  %v3472_v18 = vunpack.i.l.bf16 %v3471_v7 }
0x1135   :  { %v2449_v1 = vsel %vm1094_vm6, %v2447_v12, %v3473_v60  ;;  %v2448_v0 = vsel %vm1094_vm6, %v2446_v3, %v3472_v18 }
0x1136   :  { %v2450_v5 = vpack.c.bf16 %v2449_v1, %v2448_v0 }
0x1138   :  { %3364 = vmatmul.mubr.msk.bf16.vlgmr.msra.gmra.mrb[76].mxu0 %vm45_vm0, %v2450_v5 }
0x1139   :  { %3391 = vmatprep.mubr.msk.bf16.mxu0 %vm3621_vm1, %v3620_v15  ;;  %3376 = vmatpush3.bf16.msra.mxu0 %v3494_v22 }
0x113a   :  { %3377 = vmatprep.subr.bf16.mxu0 %v3620_v15 }
0x113d   :  { %3378 = vmatpush3.bf16.msra.mxu0 %v3495_v32 }
0x113e   :  { %3379 = vmatprep.subr.bf16.mxu0 %v3620_v15 }
0x1141   :  { %3380 = vmatpush3.bf16.msra.mxu0 %v3496_v14 }
0x1142   :  { %3381 = vmatprep.subr.bf16.mxu0 %v3620_v15 }
0x1145   :  { %3382 = vmatpush3.bf16.msra.mxu0 %v3497_v46 }
0x1146   :  { %3383 = vmatprep.subr.bf16.mxu0 %v3620_v15 }
0x1149   :  { %3384 = vmatpush3.bf16.msra.mxu0 %v3498_v52 }
0x114a   :  { %3385 = vmatprep.subr.bf16.mxu0 %v3620_v15 }
0x114d   :  { %3386 = vmatpush3.bf16.msra.mxu0 %v3499_v25  ;;  %v3007_v25 = vld [vmem:[%s4422_s8] ss:$0 sm:$0xff] }
0x114e   :  { %3387 = vmatprep.subr.bf16.mxu0 %v3620_v15 }
0x1151   :  { %3388 = vmatpush3.bf16.msra.mxu0 %v3500_v62 }
0x1152   :  { %3389 = vmatprep.subr.bf16.mxu0 %v3620_v15 }
0x1155   :  { %3390 = vmatpush3.bf16.msra.mxu0 %v3501_v63 }
0x120b   :  { %v2509_v16 = vpop.f32.mrb[76].mxu0 }
0x120c   :  { %v2510_v27 = vadd.f32 %v2509_v16, %v2459_v57  ;;  %v3365_v31 = vpop.f32.mrb[77].mxu0 }
0x120d   :  { %v2512_v33 = vpop.f32.mrb[78].mxu0 }
0x120e   :  { %v4315_v59 = vadd.f32 %v2510_v27, %v4047_v19  ;;  %v2513_v21 = vadd.f32 %v2512_v33, %v2459_v57  ;;  %v3366_v36 = vpop.f32.mrb[79].mxu0 }
0x1210   :  { %v4318_v55 = vadd.f32 %v2513_v21, %v4050_v29  ;;  %v2518_v2 = vsel %vm45_vm0, %v4315_v59, 0.0 }
0x1211   :  { %2519 = vadd.xlane.f32.xlu0 %v2518_v2 }
0x1212   :  { %v2521_v4 = vsel %vm45_vm0, %v4318_v55, 0.0 }
0x1213   :  { %2522 = vadd.xlane.f32.xlu1 %v2521_v4 }
0x129e   :  { %v2520_v48 = vpop.xlane.xlu0 %2519 }
0x129f   :  { %v2524_v47 = vmul.f32 0.03125, %v2520_v48 }
0x12a0   :  { %v2523_v56 = vpop.xlane.xlu1 %2522 }
0x12a1   :  { %v2526_v35 = vsub.f32 %v4315_v59, %v2524_v47  ;;  %v2525_v19 = vmul.f32 0.03125, %v2523_v56 }
0x12a3   :  { %v2527_v17 = vsub.f32 %v4318_v55, %v2525_v19  ;;  %v2528_v37 = vmul.f32 %v2526_v35, %v2526_v35 }
0x12a5   :  { %v2530_v29 = vsel %vm45_vm0, %v2528_v37, 0.0  ;;  %v2529_v34 = vmul.f32 %v2527_v17, %v2527_v17 }
0x12a6   :  { %2531 = vadd.xlane.f32.xlu0 %v2530_v29 }
0x12a7   :  { %v2533_v20 = vsel %vm45_vm0, %v2529_v34, 0.0 }
0x12aa   :  { %2534 = vadd.xlane.f32.xlu0 %v2533_v20 }
0x1333   :  { %v2532_v39 = vpop.xlane.xlu0 %2531 }
0x1334   :  { %v2536_v40 = vmul.f32 0.03125, %v2532_v39 }
0x1336   :  { %v2538_v42 = vadd.f32 1e-05, %v2536_v40 }
0x1337   :  { %v2535_v43 = vpop.xlane.xlu0 %2534 }
0x1338   :  { %3584 = vrsqrt.f32 %v2538_v42  ;;  %v2537_v45 = vmul.f32 0.03125, %v2535_v43 }
0x133a   :  { %v2539_v23 = vadd.f32 1e-05, %v2537_v45 }
0x133c   :  { %3586 = vrsqrt.f32 %v2539_v23 }
0x1342   :  { %v3585_v61 = vpop.eup %3584 }
0x1343   :  { %v2542_v41 = vmul.f32 %v3585_v61, %v2526_v35 }
0x1345   :  { %v2548_v51 = vmul.f32 %v2547_v49, %v2542_v41 }
0x1346   :  { %v3587_v50 = vpop.eup %3586 }
0x1347   :  { %v2543_v53 = vmul.f32 %v3587_v50, %v2527_v17  ;;  %v2554_v13 = vadd.f32 %v2553_v54, %v2548_v51  ;;  %v2756_v17 = vrot.slane %v4071_v44, %v1398_v11 }
0x1349   :  { %v2549_v58 = vmul.f32 %v2547_v49, %v2543_v53 }
0x134b   :  { %v2555_v9 = vadd.f32 %v2553_v54, %v2549_v58  ;;  %v3502_v54 = vld [vmem:[%s4423_s9] sm:$0xff]   ;;  %v3503_v58 = vld [vmem:[%s4423_s9 + $0x8] sm:$0xff]  }
0x134d   :  { %v2556_v26 = vpack.c.bf16 %v2555_v9, %v2554_v13 }
0x134f   :  { %3372 = vmatmul.mubr.msk.bf16.vlgmr.msra.gmra.mrb[72].mxu1 %vm45_vm0, %v2556_v26 }
0x1350   :  { %3399 = vmatprep.mubr.msk.bf16.mxu1 %vm3621_vm1, %v3620_v15  ;;  %3396 = vmatpush3.bf16.msra.mxu1 %v3502_v54 }
0x1351   :  { %3397 = vmatprep.subr.bf16.mxu1 %v3620_v15  ;;  %v3008_v15 = vld [vmem:[%s4422_s8 + $0x1] ss:$0 sm:$0xff]  ;;  %s3596_s8 = scalar_lea.vmem %s2899_s28, 32 }
0x1352   :  { %p3597_p0 = scmp.ne.s32.totalorder %s2899_s28, %s3596_s8  ;;  %p3602_p2 = scmp.lt.s32.totalorder %s3596_s8, %s3596_s8 }
0x1354   :  { %3398 = vmatpush3.bf16.msra.mxu1 %v3503_v58  ;;  %p3603_p3 = por %p3602_p2, %p3601_p1 }
0x1356   :  { %p3604_p4 = pnand %p3603_p3, %p3597_p0 }
0x1422   :  { %v2619_v30 = vpop.f32.mrb[72].mxu1 }
0x1423   :  { %v2620_v7 = vadd.f32 %v2979_v6, %v2619_v30  ;;  %v3373_v8 = vpop.f32.mrb[73].mxu1 }
0x1424   :  { %v2622_v10 = vpop.f32.mrb[74].mxu1 }
0x1425   :  { %v2628_v60 = vmul.f32 0.044715, %v2620_v7  ;;  %v2623_v18 = vadd.f32 %v2979_v6, %v2622_v10  ;;  %v3374_v12 = vpop.f32.mrb[75].mxu1  ;;  %v2626_v4 = vmul.f32 0.5, %v2620_v7 }
0x1427   :  { %v2630_v3 = vmul.f32 %v2628_v60, %v2620_v7  ;;  %v2629_v1 = vmul.f32 0.044715, %v2623_v18  ;;  %v2627_v48 = vmul.f32 0.5, %v2623_v18 }
0x1429   :  { %v2632_v0 = vmul.f32 %v2630_v3, %v2620_v7  ;;  %v2631_v5 = vmul.f32 %v2629_v1, %v2623_v18 }
0x142b   :  { %v2634_v57 = vadd.f32 %v2632_v0, %v2620_v7  ;;  %v2633_v16 = vmul.f32 %v2631_v5, %v2623_v18 }
0x142d   :  { %v2636_v27 = vmul.f32 0.7978846, %v2634_v57  ;;  %v2635_v31 = vadd.f32 %v2633_v16, %v2623_v18 }
0x142f   :  { %3588 = vtanh.f32 %v2636_v27  ;;  %v2637_v33 = vmul.f32 0.7978846, %v2635_v31 }
0x1431   :  { %3590 = vtanh.f32 %v2637_v33 }
0x1439   :  { %v3589_v21 = vpop.eup %3588 }
0x143a   :  { %v2640_v36 = vadd.f32 1.0, %v3589_v21 }
0x143b   :  { %v3591_v2 = vpop.eup %3590 }
0x143c   :  { %v2641_v47 = vadd.f32 1.0, %v3591_v2  ;;  %v2642_v56 = vmul.f32 %v2640_v36, %v2626_v4 }
0x143e   :  { %v2643_v35 = vmul.f32 %v2641_v47, %v2627_v48 }
0x1440   :  { %v2644_v19 = vpack.c.bf16 %v2643_v35, %v2642_v56 }
0x1442   :  { %3392 = vmatmul.mubr.bf16.vlgmr.msra.gmra.mrb[80].mxu0 %v2644_v19 }
0x1515   :  { %v2744_v37 = vpop.f32.mrb[80].mxu0 }
0x1516   :  { %v2751_v29 = vadd.f32 %v2744_v37, %v4315_v59  ;;  %v3393_v34 = vpop.f32.mrb[81].mxu0 }
0x1517   :  { %v2747_v20 = vpop.f32.mrb[82].mxu0 }
0x1518   :  { %v2752_v28 = vadd.f32 %v2747_v20, %v4318_v55  ;;  %v3394_v38 = vpop.f32.mrb[83].mxu0  ;;  %v2757_v39 = vadd.f32 %v2756_v17, %v2751_v29 }
0x151a   :  { %v2758_v40 = vadd.f32 %v2756_v17, %v2752_v28  ;;  %v2767_v42 = vsel %vm2766_vm7, %v2757_v39, 0.0 }
0x151b   :  { %2768 = vadd.xlane.f32.xlu1 %v2767_v42 }
0x151c   :  { %v2763_v43 = vrot.slane %v2758_v40, 7 }
0x151e   :  { %v2771_v24 = vsel %vm2770_vm8, %v2763_v43, 0.0 }
0x151f   :  { %2772 = vadd.xlane.f32.xlu0 %v2771_v24 }
0x15a8   :  { %v2769_v11 = vpop.xlane.xlu1 %2768 }
0x15a9   :  { %v2774_v44 = vmul.f32 0.03125, %v2769_v11 }
0x15ab   :  { %v2781_v45 = vsub.f32 %v2757_v39, %v2774_v44 }
0x15ac   :  { %v2773_v59 = vpop.xlane.xlu0 %2772 }
0x15ad   :  { %v2775_v23 = vmul.f32 0.03125, %v2773_v59  ;;  %v2783_v61 = vmul.f32 %v2781_v45, %v2781_v45 }
0x15af   :  { %v2778_v49 = vrot.slane %v2775_v23, 1  ;;  %v2790_v55 = vsel %vm2766_vm7, %v2783_v61, 0.0 }
0x15b0   :  { %2791 = vadd.xlane.f32.xlu1 %v2790_v55 }
0x15b1   :  { %v2782_v41 = vsub.f32 %v2758_v40, %v2778_v49 }
0x15b3   :  { %v2784_v50 = vmul.f32 %v2782_v41, %v2782_v41 }
0x15b5   :  { %v2787_v51 = vrot.slane %v2784_v50, 7 }
0x15b7   :  { %v2793_v53 = vsel %vm2770_vm8, %v2787_v51, 0.0 }
0x15b8   :  { %2794 = vadd.xlane.f32.xlu0 %v2793_v53 }
0x163d   :  { %v2792_v13 = vpop.xlane.xlu1 %2791 }
0x163e   :  { %v2796_v9 = vmul.f32 0.03125, %v2792_v13 }
0x1640   :  { %v2798_v26 = vadd.f32 1e-05, %v2796_v9 }
0x1642   :  { %3592 = vrsqrt.f32 %v2798_v26 }
0x1645   :  { %v2795_v22 = vpop.xlane.xlu0 %2794 }
0x1646   :  { %v2797_v32 = vmul.f32 0.03125, %v2795_v22 }
0x1648   :  { %v2799_v14 = vadd.f32 1e-05, %v2797_v32 }
0x164a   :  { %3594 = vrsqrt.f32 %v2799_v14 }
0x164c   :  { %v3593_v46 = vpop.eup %3592 }
0x164d   :  { %v2807_v52 = vmul.f32 %v3593_v46, %v2781_v45 }
0x164f   :  { %v2813_v62 = vmul.f32 %v3007_v25, %v2807_v52 }
0x1651   :  { %v2819_v6 = vadd.f32 %v3008_v15, %v2813_v62 }
0x1653   :  { %v2821_v8 = vpack.c.bf16 %v2819_v6, %v2819_v6 }
0x1654   :  { %v3595_v63 = vpop.eup %3594 }
0x1655   :  { %v2804_v30 = vrot.slane %v3595_v63, 1  ;;  %v2829_v18 = vunpack.c.l.b16 %v2821_v8 }
0x1657   :  { %v2808_v7 = vmul.f32 %v2804_v30, %v2782_v41  ;;  %v2831_v1 = vrot.slane %v2829_v18, 7 }
0x1659   :  { %v2814_v10 = vmul.f32 %v3007_v25, %v2808_v7 }
0x165b   :  { %v2820_v60 = vadd.f32 %v3008_v15, %v2814_v10 }
0x165d   :  { %v2822_v12 = vpack.c.bf16 %v2820_v60, %v2820_v60 }
0x165f   :  { %v2830_v3 = vunpack.c.l.b16 %v2822_v12 }
0x1661   :  { %v2832_v0 = vrot.slane %v2830_v3, 6 }
0x1663   :  { %v2834_v5 = vsel %vm2833_vm9, %v2832_v0, %v2831_v1 }
0x1664   :  { %v2835_v57 = vpack.c.b16 %v2834_v5, %v2834_v5 }
0x1666   :  { %3400 = vmatmul.mubr.msk.bf16.vlgmr.msra.gmra.mrb[76].mxu1 %vm45_vm0, %v2835_v57 }
0x1739   :  { %v2885_v16 = vpop.f32.mrb[76].mxu1 }
0x173a   :  { %2891 = vst [vmem:[#allocation2] sm:$0x3] %v2885_v16  ;;  %v3401_v27 = vpop.f32.mrb[77].mxu1 }
0x173b   :  { %v2888_v31 = vpop.f32.mrb[78].mxu1 }
0x173c   :  { %3607 = shalt.err (!%p3604_p4)
}
0x173d   :  { %s3608_s14 = scalar_lea.hbm %s4424_s10, 32 }
0x173e   :  { %p3609_p5 = scmp.ne.s32.totalorder %s4424_s10, %s3608_s14  ;;  %p3612_p6 = scmp.lt.u32.totalorder %s3608_s14, %s4424_s10 }
0x1740   :  { %p3614_p7 = pnand %p3612_p6, %p3609_p5 }
0x1742   :  { %3617 = shalt.err (!%p3614_p7)
}
0x1743   :  { %2901 = dma.vmem_to_hbm [thread:$0]  %s2899_s28, 32, %s4424_s10, [#allocation3]   ;;  %v3402_v33 = vpop.f32.mrb[79].mxu1 }
0x1744   :  { %3618 = dma.done.wait [#allocation3], 32  }
0x1745   :  { %3619 = vsyncadd [#allocation3], 4294967264 }
0x1746   :  { %2905 = vsyncpa [#allocation3], 1 }

</bundles_post_ra>
